<compile_context>
chip_gen: v7x
topology: tpu7x:2x2x1
jax: 0.10.0
libtpu: 0.0.40
codegen_flags: <defaults>
</compile_context>

<pallas_src>
import functools

import jax
import jax.numpy as jnp
from jax.experimental import pallas as pl
from jax.experimental.pallas import tpu as pltpu


def _encoder_block_kernel(
    x_ref, bias_ref,
    wqkv_ref, bqkv_ref, wo_ref, bo_ref,
    w1_ref, b1_ref, w2_ref, b2_ref,
    g1_ref, be1_ref, g2_ref, be2_ref,
    out_ref,
    out1_sc, acc_sc,
    *, num_heads: int, d_model: int, eps: float = 1e-6,
):
    c = pl.program_id(1)
    num_chunks = pl.num_programs(1)
    S = x_ref.shape[1]
    D = d_model
    H = num_heads
    dh = D // H
    bf16 = jnp.bfloat16
    n = jnp.float32(S * D)

    # ---- chunk 0: fused QKV + attention + residual + LayerNorm1 -------------
    @pl.when(c == 0)
    def _attn_and_ln1():
        x = x_ref[0]                                        # (S, D) f32
        x_bf = x.astype(bf16)

        # Fused QKV: one (S, D) x (D, 3D) MXU pass, f32 accumulation.
        qkv = (jnp.dot(x_bf, wqkv_ref[...],
                       preferred_element_type=jnp.float32) + bqkv_ref[...])
        q, k, v = qkv[:, :D], qkv[:, D:2 * D], qkv[:, 2 * D:]

        # (S, D) -> (H, S, dh) batched-head layout.
        qh = jnp.transpose(q.reshape(S, H, dh), (1, 0, 2)).astype(bf16)
        kh = jnp.transpose(k.reshape(S, H, dh), (1, 0, 2)).astype(bf16)
        vh = jnp.transpose(v.reshape(S, H, dh), (1, 0, 2)).astype(bf16)

        scale = jnp.float32(1.0 / (dh ** 0.5))
        s = jnp.einsum('hqd,hkd->hqk', qh, kh,
                       preferred_element_type=jnp.float32) * scale   # (H,S,S)
        s = s + bias_ref[0, 0, :][None, None, :]           # additive mask bias
        s = s - jnp.max(s, axis=-1, keepdims=True)
        p = jnp.exp(s)                                      # f32
        p = p * pl.reciprocal(jnp.sum(p, axis=-1, keepdims=True), approx=True)

        o_h = jnp.einsum('hqk,hkd->hqd', p.astype(bf16), vh,
                         preferred_element_type=jnp.float32)          # (H,S,dh)
        attn = jnp.transpose(o_h, (1, 0, 2)).reshape(S, D)

        attn_out = (jnp.dot(attn.astype(bf16), wo_ref[...],
                            preferred_element_type=jnp.float32) + bo_ref[...])

        # dropout1: eval mode -> identity

        # LayerNorm1 over [S, D] jointly (single-pass sum / sum-of-squares).
        y1 = x + attn_out
        s1 = jnp.sum(y1, keepdims=True)
        s2 = jnp.sum(y1 * y1, keepdims=True)
        mu = s1 / n
        var = s2 / n - mu * mu
        out1_sc[...] = ((y1 - mu) * jax.lax.rsqrt(var + eps)
                        * g1_ref[...] + be1_ref[...])
        acc_sc[...] = jnp.zeros_like(acc_sc)

    # ---- every chunk: stream one slice of the FFN weights -------------------
    out1_bf = out1_sc[...].astype(bf16)
    h = (jnp.dot(out1_bf, w1_ref[...],
                 preferred_element_type=jnp.float32) + b1_ref[...])
    h = jnp.maximum(h, 0.0)                                 # ReLU in f32
    acc_sc[...] += jnp.dot(h.astype(bf16), w2_ref[...],
                           preferred_element_type=jnp.float32)

    # ---- last chunk: bias, residual, LayerNorm2, write out ------------------
    @pl.when(c == num_chunks - 1)
    def _ln2_and_store():
        out1 = out1_sc[...]
        ffn = acc_sc[...] + b2_ref[...]
        # dropout2: eval mode -> identity
        y2 = out1 + ffn
        s1 = jnp.sum(y2, keepdims=True)
        s2 = jnp.sum(y2 * y2, keepdims=True)
        mu = s1 / n
        var = s2 / n - mu * mu
        out2 = ((y2 - mu) * jax.lax.rsqrt(var + eps)
                * g2_ref[...] + be2_ref[...])
        out_ref[0] = out2.astype(out_ref.dtype)


def _pick_dff_chunk(dff: int, target: int) -> int:
    """Largest divisor of dff that is a multiple of 128 and <= target, else dff."""
    cand = (min(target, dff) // 128) * 128
    while cand >= 128:
        if dff % cand == 0:
            return cand
        cand -= 128
    return dff


def encoder_block(x, mask, params, *, num_heads, dff_chunk=512):
    B, S, D = x.shape
    dff = params["w1"].shape[1]
    chunk = _pick_dff_chunk(dff, dff_chunk)
    num_chunks = dff // chunk

    bf16 = jnp.bfloat16
    # Fused QKV weight/bias: one wide MXU pass instead of three.
    wqkv = jnp.concatenate(
        [params["wq"], params["wk"], params["wv"]], axis=1).astype(bf16)
    bqkv = jnp.concatenate(
        [params["bq"], params["bk"], params["bv"]], axis=1).astype(jnp.float32)
    wo = params["wo"].astype(bf16)
    w1 = params["w1"].astype(bf16)
    w2 = params["w2"].astype(bf16)

    # Additive mask bias precomputed once: 1.0 = masked -> -1e9, 0.0 -> 0.
    mask_bias = mask.reshape(B, 1, S).astype(jnp.float32) * jnp.float32(-1e9)

    def full(arr):
        nd = arr.ndim
        return pl.BlockSpec(arr.shape, lambda b, c, _nd=nd: (0,) * _nd)

    # VMEM budget: resident blocks (x2 pipeline buffers) + in-kernel working
    # set, clamped to the chip's physical VMEM (v7x only has 64 MiB).
    H = num_heads
    est = (
        2 * 2 * (4 * D * D + D * chunk + chunk * D)            # bf16 weights x2 bufs
        + 2 * 4 * (3 * D + 2 * D + chunk + S)                  # biases + mask bias
        + 2 * 4 * 4 * S * D                                    # gamma/beta (f32)
        + 2 * 4 * 2 * S * D                                    # x + out blocks
        + 4 * 2 * S * D                                        # scratch (out1 + acc)
        + 4 * (14 * S * D + 2 * H * S * S + 2 * S * chunk)     # working temporaries
    )
    try:
        vmem_cap = int(pltpu.get_tpu_info().vmem_capacity_bytes)
    except Exception:
        vmem_cap = 64 << 20
    vmem_limit = int(min(max(2 * est, 32 << 20), vmem_cap * 3 // 4))

    kernel = functools.partial(
        _encoder_block_kernel, num_heads=num_heads, d_model=D)

    return pl.pallas_call(
        kernel,
        out_shape=jax.ShapeDtypeStruct((B, S, D), jnp.float32),
        grid_spec=pltpu.PrefetchScalarGridSpec(
            num_scalar_prefetch=0,
            grid=(B, num_chunks),
            in_specs=[
                pl.BlockSpec((1, S, D), lambda b, c: (b, 0, 0)),    # x
                pl.BlockSpec((1, 1, S), lambda b, c: (b, 0, 0)),    # mask bias
                full(wqkv), full(bqkv),
                full(wo), full(params["bo"]),
                pl.BlockSpec((D, chunk), lambda b, c: (0, c)),      # w1 slice
                pl.BlockSpec((1, chunk), lambda b, c: (0, c)),      # b1 slice
                pl.BlockSpec((chunk, D), lambda b, c: (c, 0)),      # w2 slice
                full(params["b2"]),
                full(params["gamma1"]), full(params["beta1"]),
                full(params["gamma2"]), full(params["beta2"]),
            ],
            out_specs=pl.BlockSpec((1, S, D), lambda b, c: (b, 0, 0)),
            scratch_shapes=[
                pltpu.VMEM((S, D), jnp.float32),   # out1 (post-LayerNorm1)
                pltpu.VMEM((S, D), jnp.float32),   # FFN accumulator
            ],
        ),
        compiler_params=pltpu.CompilerParams(
            dimension_semantics=("parallel", "arbitrary"),
            vmem_limit_bytes=vmem_limit,
        ),
    )(
        x, mask_bias,
        wqkv, bqkv, wo, params["bo"],
        w1, params["b1"], w2, params["b2"],
        params["gamma1"], params["beta1"], params["gamma2"], params["beta2"],
    )


def init_params(key, seq_len, d_model, dff):
    ks = jax.random.split(key, 10)
    s = 0.02
    return {
        "wq": s * jax.random.normal(ks[0], (d_model, d_model), jnp.float32),
        "bq": jnp.zeros((1, d_model), jnp.float32),
        "wk": s * jax.random.normal(ks[1], (d_model, d_model), jnp.float32),
        "bk": jnp.zeros((1, d_model), jnp.float32),
        "wv": s * jax.random.normal(ks[2], (d_model, d_model), jnp.float32),
        "bv": jnp.zeros((1, d_model), jnp.float32),
        "wo": s * jax.random.normal(ks[3], (d_model, d_model), jnp.float32),
        "bo": jnp.zeros((1, d_model), jnp.float32),
        "w1": s * jax.random.normal(ks[4], (d_model, dff), jnp.float32),
        "b1": jnp.zeros((1, dff), jnp.float32),
        "w2": s * jax.random.normal(ks[5], (dff, d_model), jnp.float32),
        "b2": jnp.zeros((1, d_model), jnp.float32),
        # LayerNorm(normalized_shape=[seq_len, d_model]) -> affine over (S, D)
        "gamma1": jnp.ones((seq_len, d_model), jnp.float32),
        "beta1": jnp.zeros((seq_len, d_model), jnp.float32),
        "gamma2": jnp.ones((seq_len, d_model), jnp.float32),
        "beta2": jnp.zeros((seq_len, d_model), jnp.float32),
    }


if __name__ == "__main__":
    # Small but lane-dense shapes: D=128 keeps output stores unmasked.
    # dff=512 with chunk=256 exercises the 2-step streamed-FFN accumulation.
    B, S, D, H, DFF = 2, 8, 128, 4, 512   # d_input == d_model (residual needs it)

    key = jax.random.PRNGKey(0)
    kx, km, kp = jax.random.split(key, 3)

    x = jax.random.normal(kx, (B, S, D), jnp.float32)
    # padding mask: 1.0 = masked position, 0.0 = attend
    mask = (jax.random.uniform(km, (B, 1, 1, S)) > 0.75).astype(jnp.float32)
    params = init_params(kp, S, D, DFF)

    out = encoder_block(x, mask, params, num_heads=H, dff_chunk=256)
    jax.block_until_ready(out)
    assert out.shape == (B, S, D)
    print("KERNEL_OK")
</pallas_src>

<mosaic_0001>
module attributes {stable_mosaic.version = 11 : i64} {
  func.func @_encoder_block_kernel(%arg0: i32, %arg1: i32, %arg2: memref<1x8x128xf32, #tpu.memory_space<vmem>>, %arg3: memref<1x1x8xf32, #tpu.memory_space<vmem>>, %arg4: memref<128x384xbf16, #tpu.memory_space<vmem>>, %arg5: memref<1x384xf32, #tpu.memory_space<vmem>>, %arg6: memref<128x128xbf16, #tpu.memory_space<vmem>>, %arg7: memref<1x128xf32, #tpu.memory_space<vmem>>, %arg8: memref<128x256xbf16, #tpu.memory_space<vmem>>, %arg9: memref<1x256xf32, #tpu.memory_space<vmem>>, %arg10: memref<256x128xbf16, #tpu.memory_space<vmem>>, %arg11: memref<1x128xf32, #tpu.memory_space<vmem>>, %arg12: memref<8x128xf32, #tpu.memory_space<vmem>>, %arg13: memref<8x128xf32, #tpu.memory_space<vmem>>, %arg14: memref<8x128xf32, #tpu.memory_space<vmem>>, %arg15: memref<8x128xf32, #tpu.memory_space<vmem>>, %arg16: memref<1x8x128xf32, #tpu.memory_space<vmem>>, %arg17: memref<8x128xf32, #tpu.memory_space<vmem>>, %arg18: memref<8x128xf32, #tpu.memory_space<vmem>>) attributes {dimension_semantics = [#tpu.dimension_semantics<parallel>, #tpu.dimension_semantics<arbitrary>], iteration_bounds = array<i64: 2, 2>, scalar_prefetch = 0 : i64, scratch_operands = 2 : i64, tpu.core_type = #tpu.core_type<tc>, window_params = [{transform_indices = @transform_0, window_bounds = array<i64: 1, 8, 128>}, {transform_indices = @transform_1, window_bounds = array<i64: 1, 1, 8>}, {pipeline_mode = #tpu.pipeline_mode<synchronous>, transform_indices = @transform_2, window_bounds = array<i64: 128, 384>}, {pipeline_mode = #tpu.pipeline_mode<synchronous>, transform_indices = @transform_3, window_bounds = array<i64: 1, 384>}, {pipeline_mode = #tpu.pipeline_mode<synchronous>, transform_indices = @transform_4, window_bounds = array<i64: 128, 128>}, {pipeline_mode = #tpu.pipeline_mode<synchronous>, transform_indices = @transform_5, window_bounds = array<i64: 1, 128>}, {transform_indices = @transform_6, window_bounds = array<i64: 128, 256>}, {transform_indices = @transform_7, window_bounds = array<i64: 1, 256>}, {transform_indices = @transform_8, window_bounds = array<i64: 256, 128>}, {pipeline_mode = #tpu.pipeline_mode<synchronous>, transform_indices = @transform_9, window_bounds = array<i64: 1, 128>}, {pipeline_mode = #tpu.pipeline_mode<synchronous>, transform_indices = @transform_10, window_bounds = array<i64: 8, 128>}, {pipeline_mode = #tpu.pipeline_mode<synchronous>, transform_indices = @transform_11, window_bounds = array<i64: 8, 128>}, {pipeline_mode = #tpu.pipeline_mode<synchronous>, transform_indices = @transform_12, window_bounds = array<i64: 8, 128>}, {pipeline_mode = #tpu.pipeline_mode<synchronous>, transform_indices = @transform_13, window_bounds = array<i64: 8, 128>}, {transform_indices = @transform_14, window_bounds = array<i64: 1, 8, 128>}]} {
    %c0_i32 = arith.constant 0 : i32
    %0 = arith.cmpi eq, %arg1, %c0_i32 : i32
    %1 = arith.extui %0 : i1 to i32
    %cst = arith.constant 1.024000e+03 : f32
    %c0_i32_0 = arith.constant 0 : i32
    %2 = arith.cmpi ne, %1, %c0_i32_0 : i32
    scf.if %2 {
      %c0_17 = arith.constant 0 : index
      %c0_18 = arith.constant 0 : index
      %c0_19 = arith.constant 0 : index
      %21 = vector.load %arg2[%c0_17, %c0_18, %c0_19] : memref<1x8x128xf32, #tpu.memory_space<vmem>>, vector<1x8x128xf32>
      %22 = vector.shape_cast %21 : vector<1x8x128xf32> to vector<8x128xf32>
      %23 = arith.truncf %22 : vector<8x128xf32> to vector<8x128xbf16>
      %c0_20 = arith.constant 0 : index
      %c0_21 = arith.constant 0 : index
      %24 = vector.load %arg4[%c0_20, %c0_21] : memref<128x384xbf16, #tpu.memory_space<vmem>>, vector<128x384xbf16>
      %cst_22 = arith.constant dense<0.000000e+00> : vector<8x384xf32>
      %25 = tpu.matmul %23, %24, %cst_22 {dimension_numbers = #tpu.dot_dimension_numbers<[1], [0], [0], [1], [0, 0, 1, 1], [], []>} : vector<8x128xbf16>, vector<128x384xbf16>, vector<8x384xf32> -> vector<8x384xf32>
      %c0_23 = arith.constant 0 : index
      %c0_24 = arith.constant 0 : index
      %26 = vector.load %arg5[%c0_23, %c0_24] : memref<1x384xf32, #tpu.memory_space<vmem>>, vector<1x384xf32>
      %27 = vector.broadcast %26 : vector<1x384xf32> to vector<8x384xf32>
      %28 = arith.addf %25, %27 : vector<8x384xf32>
      %29 = vector.extract_strided_slice %28 {offsets = [0, 0], sizes = [8, 128], strides = [1, 1]} : vector<8x384xf32> to vector<8x128xf32>
      %30 = vector.extract_strided_slice %28 {offsets = [0, 128], sizes = [8, 128], strides = [1, 1]} : vector<8x384xf32> to vector<8x128xf32>
      %31 = vector.extract_strided_slice %28 {offsets = [0, 256], sizes = [8, 128], strides = [1, 1]} : vector<8x384xf32> to vector<8x128xf32>
      %32 = vector.shape_cast %29 : vector<8x128xf32> to vector<8x4x32xf32>
      %33 = tpu.transpose %32, [1, 0, 2] : vector<8x4x32xf32> -> vector<4x8x32xf32>
      %34 = arith.truncf %33 : vector<4x8x32xf32> to vector<4x8x32xbf16>
      %35 = vector.shape_cast %30 : vector<8x128xf32> to vector<8x4x32xf32>
      %36 = tpu.transpose %35, [1, 0, 2] : vector<8x4x32xf32> -> vector<4x8x32xf32>
      %37 = arith.truncf %36 : vector<4x8x32xf32> to vector<4x8x32xbf16>
      %38 = vector.shape_cast %31 : vector<8x128xf32> to vector<8x4x32xf32>
      %39 = tpu.transpose %38, [1, 0, 2] : vector<8x4x32xf32> -> vector<4x8x32xf32>
      %40 = arith.truncf %39 : vector<4x8x32xf32> to vector<4x8x32xbf16>
      "tpu.trace_start"() <{level = 10 : i32, message = "hqd,hkd->hqk"}> : () -> ()
      %cst_25 = arith.constant dense<0.000000e+00> : vector<4x8x8xf32>
      %41 = tpu.matmul %34, %37, %cst_25 {dimension_numbers = #tpu.dot_dimension_numbers<[2], [2], [1], [1], [0, 0, 0, 1, 1, 1], [0], [0]>} : vector<4x8x32xbf16>, vector<4x8x32xbf16>, vector<4x8x8xf32> -> vector<4x8x8xf32>
      "tpu.trace_stop"() : () -> ()
      %cst_26 = arith.constant 0.176776692 : f32
      %42 = vector.broadcast %cst_26 : f32 to vector<4x8x8xf32>
      %43 = arith.mulf %41, %42 : vector<4x8x8xf32>
      %c0_27 = arith.constant 0 : index
      %c0_28 = arith.constant 0 : index
      %c0_29 = arith.constant 0 : index
      %44 = vector.load %arg3[%c0_27, %c0_28, %c0_29] : memref<1x1x8xf32, #tpu.memory_space<vmem>>, vector<1x1x8xf32>
      %45 = vector.shape_cast %44 : vector<1x1x8xf32> to vector<8xf32>
      %46 = vector.shape_cast %45 : vector<8xf32> to vector<1x1x8xf32>
      %47 = vector.broadcast %46 : vector<1x1x8xf32> to vector<4x8x8xf32>
      %48 = arith.addf %43, %47 : vector<4x8x8xf32>
      %cst_30 = arith.constant dense<0xFF800000> : vector<4x8xf32>
      %49 = vector.multi_reduction <maximumf>, %48, %cst_30 [2] : vector<4x8x8xf32> to vector<4x8xf32>
      %50 = vector.shape_cast %49 : vector<4x8xf32> to vector<4x8x1xf32>
      %51 = vector.broadcast %50 : vector<4x8x1xf32> to vector<4x8x8xf32>
      %52 = arith.subf %48, %51 : vector<4x8x8xf32>
      %53 = math.exp %52 : vector<4x8x8xf32>
      %cst_31 = arith.constant dense<0.000000e+00> : vector<4x8xf32>
      %54 = vector.multi_reduction <add>, %53, %cst_31 [2] : vector<4x8x8xf32> to vector<4x8xf32>
      %55 = vector.shape_cast %54 : vector<4x8xf32> to vector<4x8x1xf32>
      %56 = tpu.reciprocal %55 {approx = true} : vector<4x8x1xf32> -> vector<4x8x1xf32>
      %57 = vector.broadcast %56 : vector<4x8x1xf32> to vector<4x8x8xf32>
      %58 = arith.mulf %53, %57 : vector<4x8x8xf32>
      %59 = arith.truncf %58 : vector<4x8x8xf32> to vector<4x8x8xbf16>
      "tpu.trace_start"() <{level = 10 : i32, message = "hqk,hkd->hqd"}> : () -> ()
      %cst_32 = arith.constant dense<0.000000e+00> : vector<4x8x32xf32>
      %60 = tpu.matmul %59, %40, %cst_32 {dimension_numbers = #tpu.dot_dimension_numbers<[2], [1], [1], [2], [0, 0, 0, 1, 1, 2], [0], [0]>} : vector<4x8x8xbf16>, vector<4x8x32xbf16>, vector<4x8x32xf32> -> vector<4x8x32xf32>
      "tpu.trace_stop"() : () -> ()
      %61 = tpu.transpose %60, [1, 0, 2] : vector<4x8x32xf32> -> vector<8x4x32xf32>
      %62 = vector.shape_cast %61 : vector<8x4x32xf32> to vector<8x128xf32>
      %63 = arith.truncf %62 : vector<8x128xf32> to vector<8x128xbf16>
      %c0_33 = arith.constant 0 : index
      %c0_34 = arith.constant 0 : index
      %64 = vector.load %arg6[%c0_33, %c0_34] : memref<128x128xbf16, #tpu.memory_space<vmem>>, vector<128x128xbf16>
      %cst_35 = arith.constant dense<0.000000e+00> : vector<8x128xf32>
      %65 = tpu.matmul %63, %64, %cst_35 {dimension_numbers = #tpu.dot_dimension_numbers<[1], [0], [0], [1], [0, 0, 1, 1], [], []>} : vector<8x128xbf16>, vector<128x128xbf16>, vector<8x128xf32> -> vector<8x128xf32>
      %c0_36 = arith.constant 0 : index
      %c0_37 = arith.constant 0 : index
      %66 = vector.load %arg7[%c0_36, %c0_37] : memref<1x128xf32, #tpu.memory_space<vmem>>, vector<1x128xf32>
      %67 = vector.broadcast %66 : vector<1x128xf32> to vector<8x128xf32>
      %68 = arith.addf %65, %67 : vector<8x128xf32>
      %69 = arith.addf %22, %68 : vector<8x128xf32>
      %70 = vector.shape_cast %69 : vector<8x128xf32> to vector<1x8x128xf32>
      %cst_38 = arith.constant dense<0.000000e+00> : vector<1xf32>
      %71 = vector.multi_reduction <add>, %70, %cst_38 [1, 2] : vector<1x8x128xf32> to vector<1xf32>
      %72 = vector.shape_cast %71 : vector<1xf32> to vector<1x1x1xf32>
      %73 = vector.extract %72[0, 0, 0] : f32 from vector<1x1x1xf32>
      %74 = vector.broadcast %73 : f32 to vector<1x1xf32>
      %75 = arith.mulf %69, %69 : vector<8x128xf32>
      %76 = vector.shape_cast %75 : vector<8x128xf32> to vector<1x8x128xf32>
      %cst_39 = arith.constant dense<0.000000e+00> : vector<1xf32>
      %77 = vector.multi_reduction <add>, %76, %cst_39 [1, 2] : vector<1x8x128xf32> to vector<1xf32>
      %78 = vector.shape_cast %77 : vector<1xf32> to vector<1x1x1xf32>
      %79 = vector.extract %78[0, 0, 0] : f32 from vector<1x1x1xf32>
      %80 = vector.broadcast %79 : f32 to vector<1x1xf32>
      %81 = vector.broadcast %cst : f32 to vector<1x1xf32>
      %82 = arith.divf %74, %81 : vector<1x1xf32>
      %83 = vector.broadcast %cst : f32 to vector<1x1xf32>
      %84 = arith.divf %80, %83 : vector<1x1xf32>
      %85 = arith.mulf %82, %82 : vector<1x1xf32>
      %86 = arith.subf %84, %85 : vector<1x1xf32>
      %87 = vector.broadcast %82 : vector<1x1xf32> to vector<8x128xf32>
      %88 = arith.subf %69, %87 : vector<8x128xf32>
      %cst_40 = arith.constant 9.99999997E-7 : f32
      %89 = vector.broadcast %cst_40 : f32 to vector<1x1xf32>
      %90 = arith.addf %86, %89 : vector<1x1xf32>
      %91 = math.rsqrt %90 : vector<1x1xf32>
      %92 = vector.broadcast %91 : vector<1x1xf32> to vector<8x128xf32>
      %93 = arith.mulf %88, %92 : vector<8x128xf32>
      %c0_41 = arith.constant 0 : index
      %c0_42 = arith.constant 0 : index
      %94 = vector.load %arg12[%c0_41, %c0_42] : memref<8x128xf32, #tpu.memory_space<vmem>>, vector<8x128xf32>
      %95 = arith.mulf %93, %94 : vector<8x128xf32>
      %c0_43 = arith.constant 0 : index
      %c0_44 = arith.constant 0 : index
      %96 = vector.load %arg13[%c0_43, %c0_44] : memref<8x128xf32, #tpu.memory_space<vmem>>, vector<8x128xf32>
      %97 = arith.addf %95, %96 : vector<8x128xf32>
      %c0_45 = arith.constant 0 : index
      %c0_46 = arith.constant 0 : index
      %98 = vector.load %arg17[%c0_45, %c0_46] : memref<8x128xf32, #tpu.memory_space<vmem>>, vector<8x128xf32>
      tpu.vector_store %arg17[%c0_45, %c0_46], %97 {strides = array<i32>} : memref<8x128xf32, #tpu.memory_space<vmem>>, vector<8x128xf32>,
      %cst_47 = arith.constant 0.000000e+00 : f32
      %99 = vector.broadcast %cst_47 : f32 to vector<8x128xf32>
      %c0_48 = arith.constant 0 : index
      %c0_49 = arith.constant 0 : index
      %100 = vector.load %arg18[%c0_48, %c0_49] : memref<8x128xf32, #tpu.memory_space<vmem>>, vector<8x128xf32>
      tpu.vector_store %arg18[%c0_48, %c0_49], %99 {strides = array<i32>} : memref<8x128xf32, #tpu.memory_space<vmem>>, vector<8x128xf32>,
    } else {
    }
    %c0 = arith.constant 0 : index
    %c0_1 = arith.constant 0 : index
    %3 = vector.load %arg17[%c0, %c0_1] : memref<8x128xf32, #tpu.memory_space<vmem>>, vector<8x128xf32>
    %4 = arith.truncf %3 : vector<8x128xf32> to vector<8x128xbf16>
    %c0_2 = arith.constant 0 : index
    %c0_3 = arith.constant 0 : index
    %5 = vector.load %arg8[%c0_2, %c0_3] : memref<128x256xbf16, #tpu.memory_space<vmem>>, vector<128x256xbf16>
    %cst_4 = arith.constant dense<0.000000e+00> : vector<8x256xf32>
    %6 = tpu.matmul %4, %5, %cst_4 {dimension_numbers = #tpu.dot_dimension_numbers<[1], [0], [0], [1], [0, 0, 1, 1], [], []>} : vector<8x128xbf16>, vector<128x256xbf16>, vector<8x256xf32> -> vector<8x256xf32>
    %c0_5 = arith.constant 0 : index
    %c0_6 = arith.constant 0 : index
    %7 = vector.load %arg9[%c0_5, %c0_6] : memref<1x256xf32, #tpu.memory_space<vmem>>, vector<1x256xf32>
    %8 = vector.broadcast %7 : vector<1x256xf32> to vector<8x256xf32>
    %9 = arith.addf %6, %8 : vector<8x256xf32>
    %cst_7 = arith.constant 0.000000e+00 : f32
    %10 = vector.broadcast %cst_7 : f32 to vector<8x256xf32>
    %11 = arith.maximumf %9, %10 : vector<8x256xf32>
    %c0_8 = arith.constant 0 : index
    %c0_9 = arith.constant 0 : index
    %12 = vector.load %arg18[%c0_8, %c0_9] : memref<8x128xf32, #tpu.memory_space<vmem>>, vector<8x128xf32>
    %13 = arith.truncf %11 : vector<8x256xf32> to vector<8x256xbf16>
    %c0_10 = arith.constant 0 : index
    %c0_11 = arith.constant 0 : index
    %14 = vector.load %arg10[%c0_10, %c0_11] : memref<256x128xbf16, #tpu.memory_space<vmem>>, vector<256x128xbf16>
    %cst_12 = arith.constant dense<0.000000e+00> : vector<8x128xf32>
    %15 = tpu.matmul %13, %14, %cst_12 {dimension_numbers = #tpu.dot_dimension_numbers<[1], [0], [0], [1], [0, 0, 1, 1], [], []>} : vector<8x256xbf16>, vector<256x128xbf16>, vector<8x128xf32> -> vector<8x128xf32>
    %16 = arith.addf %12, %15 : vector<8x128xf32>
    %c0_13 = arith.constant 0 : index
    %c0_14 = arith.constant 0 : index
    %17 = vector.load %arg18[%c0_13, %c0_14] : memref<8x128xf32, #tpu.memory_space<vmem>>, vector<8x128xf32>
    tpu.vector_store %arg18[%c0_13, %c0_14], %16 {strides = array<i32>} : memref<8x128xf32, #tpu.memory_space<vmem>>, vector<8x128xf32>,
    %c1_i32 = arith.constant 1 : i32
    %18 = arith.cmpi eq, %arg1, %c1_i32 : i32
    %19 = arith.extui %18 : i1 to i32
    %cst_15 = arith.constant 1.024000e+03 : f32
    %c0_i32_16 = arith.constant 0 : i32
    %20 = arith.cmpi ne, %19, %c0_i32_16 : i32
    scf.if %20 {
      %c0_17 = arith.constant 0 : index
      %c0_18 = arith.constant 0 : index
      %21 = vector.load %arg17[%c0_17, %c0_18] : memref<8x128xf32, #tpu.memory_space<vmem>>, vector<8x128xf32>
      %c0_19 = arith.constant 0 : index
      %c0_20 = arith.constant 0 : index
      %22 = vector.load %arg18[%c0_19, %c0_20] : memref<8x128xf32, #tpu.memory_space<vmem>>, vector<8x128xf32>
      %c0_21 = arith.constant 0 : index
      %c0_22 = arith.constant 0 : index
      %23 = vector.load %arg11[%c0_21, %c0_22] : memref<1x128xf32, #tpu.memory_space<vmem>>, vector<1x128xf32>
      %24 = vector.broadcast %23 : vector<1x128xf32> to vector<8x128xf32>
      %25 = arith.addf %22, %24 : vector<8x128xf32>
      %26 = arith.addf %21, %25 : vector<8x128xf32>
      %27 = vector.shape_cast %26 : vector<8x128xf32> to vector<1x8x128xf32>
      %cst_23 = arith.constant dense<0.000000e+00> : vector<1xf32>
      %28 = vector.multi_reduction <add>, %27, %cst_23 [1, 2] : vector<1x8x128xf32> to vector<1xf32>
      %29 = vector.shape_cast %28 : vector<1xf32> to vector<1x1x1xf32>
      %30 = vector.extract %29[0, 0, 0] : f32 from vector<1x1x1xf32>
      %31 = vector.broadcast %30 : f32 to vector<1x1xf32>
      %32 = arith.mulf %26, %26 : vector<8x128xf32>
      %33 = vector.shape_cast %32 : vector<8x128xf32> to vector<1x8x128xf32>
      %cst_24 = arith.constant dense<0.000000e+00> : vector<1xf32>
      %34 = vector.multi_reduction <add>, %33, %cst_24 [1, 2] : vector<1x8x128xf32> to vector<1xf32>
      %35 = vector.shape_cast %34 : vector<1xf32> to vector<1x1x1xf32>
      %36 = vector.extract %35[0, 0, 0] : f32 from vector<1x1x1xf32>
      %37 = vector.broadcast %36 : f32 to vector<1x1xf32>
      %38 = vector.broadcast %cst_15 : f32 to vector<1x1xf32>
      %39 = arith.divf %31, %38 : vector<1x1xf32>
      %40 = vector.broadcast %cst_15 : f32 to vector<1x1xf32>
      %41 = arith.divf %37, %40 : vector<1x1xf32>
      %42 = arith.mulf %39, %39 : vector<1x1xf32>
      %43 = arith.subf %41, %42 : vector<1x1xf32>
      %44 = vector.broadcast %39 : vector<1x1xf32> to vector<8x128xf32>
      %45 = arith.subf %26, %44 : vector<8x128xf32>
      %cst_25 = arith.constant 9.99999997E-7 : f32
      %46 = vector.broadcast %cst_25 : f32 to vector<1x1xf32>
      %47 = arith.addf %43, %46 : vector<1x1xf32>
      %48 = math.rsqrt %47 : vector<1x1xf32>
      %49 = vector.broadcast %48 : vector<1x1xf32> to vector<8x128xf32>
      %50 = arith.mulf %45, %49 : vector<8x128xf32>
      %c0_26 = arith.constant 0 : index
      %c0_27 = arith.constant 0 : index
      %51 = vector.load %arg14[%c0_26, %c0_27] : memref<8x128xf32, #tpu.memory_space<vmem>>, vector<8x128xf32>
      %52 = arith.mulf %50, %51 : vector<8x128xf32>
      %c0_28 = arith.constant 0 : index
      %c0_29 = arith.constant 0 : index
      %53 = vector.load %arg15[%c0_28, %c0_29] : memref<8x128xf32, #tpu.memory_space<vmem>>, vector<8x128xf32>
      %54 = arith.addf %52, %53 : vector<8x128xf32>
      %c0_30 = arith.constant 0 : index
      %c0_31 = arith.constant 0 : index
      %c0_32 = arith.constant 0 : index
      %55 = vector.load %arg16[%c0_30, %c0_31, %c0_32] : memref<1x8x128xf32, #tpu.memory_space<vmem>>, vector<1x8x128xf32>
      %56 = vector.shape_cast %55 : vector<1x8x128xf32> to vector<8x128xf32>
      %57 = vector.shape_cast %54 : vector<8x128xf32> to vector<1x8x128xf32>
      tpu.vector_store %arg16[%c0_30, %c0_31, %c0_32], %57 {strides = array<i32>} : memref<1x8x128xf32, #tpu.memory_space<vmem>>, vector<1x8x128xf32>,
    } else {
    }
    return
  }
  func.func @transform_0(%arg0: i32, %arg1: i32) -> (i32, i32, i32) {
    %c0_i32 = arith.constant 0 : i32
    %c0_i32_0 = arith.constant 0 : i32
    %c0_i32_1 = arith.constant 0 : i32
    return %arg0, %c0_i32, %c0_i32_0 : i32, i32, i32
  }
  func.func @transform_1(%arg0: i32, %arg1: i32) -> (i32, i32, i32) {
    %c0_i32 = arith.constant 0 : i32
    %c0_i32_0 = arith.constant 0 : i32
    %c0_i32_1 = arith.constant 0 : i32
    return %arg0, %c0_i32, %c0_i32_0 : i32, i32, i32
  }
  func.func @transform_2(%arg0: i32, %arg1: i32) -> (i32, i32) {
    %c0_i32 = arith.constant 0 : i32
    %c0_i32_0 = arith.constant 0 : i32
    %c0_i32_1 = arith.constant 0 : i32
    return %c0_i32, %c0_i32_0 : i32, i32
  }
  func.func @transform_3(%arg0: i32, %arg1: i32) -> (i32, i32) {
    %c0_i32 = arith.constant 0 : i32
    %c0_i32_0 = arith.constant 0 : i32
    %c0_i32_1 = arith.constant 0 : i32
    return %c0_i32, %c0_i32_0 : i32, i32
  }
  func.func @transform_4(%arg0: i32, %arg1: i32) -> (i32, i32) {
    %c0_i32 = arith.constant 0 : i32
    %c0_i32_0 = arith.constant 0 : i32
    %c0_i32_1 = arith.constant 0 : i32
    return %c0_i32, %c0_i32_0 : i32, i32
  }
  func.func @transform_5(%arg0: i32, %arg1: i32) -> (i32, i32) {
    %c0_i32 = arith.constant 0 : i32
    %c0_i32_0 = arith.constant 0 : i32
    %c0_i32_1 = arith.constant 0 : i32
    return %c0_i32, %c0_i32_0 : i32, i32
  }
  func.func @transform_6(%arg0: i32, %arg1: i32) -> (i32, i32) {
    %c0_i32 = arith.constant 0 : i32
    %c0_i32_0 = arith.constant 0 : i32
    return %c0_i32, %arg1 : i32, i32
  }
  func.func @transform_7(%arg0: i32, %arg1: i32) -> (i32, i32) {
    %c0_i32 = arith.constant 0 : i32
    %c0_i32_0 = arith.constant 0 : i32
    return %c0_i32, %arg1 : i32, i32
  }
  func.func @transform_8(%arg0: i32, %arg1: i32) -> (i32, i32) {
    %c0_i32 = arith.constant 0 : i32
    %c0_i32_0 = arith.constant 0 : i32
    return %arg1, %c0_i32 : i32, i32
  }
  func.func @transform_9(%arg0: i32, %arg1: i32) -> (i32, i32) {
    %c0_i32 = arith.constant 0 : i32
    %c0_i32_0 = arith.constant 0 : i32
    %c0_i32_1 = arith.constant 0 : i32
    return %c0_i32, %c0_i32_0 : i32, i32
  }
  func.func @transform_10(%arg0: i32, %arg1: i32) -> (i32, i32) {
    %c0_i32 = arith.constant 0 : i32
    %c0_i32_0 = arith.constant 0 : i32
    %c0_i32_1 = arith.constant 0 : i32
    return %c0_i32, %c0_i32_0 : i32, i32
  }
  func.func @transform_11(%arg0: i32, %arg1: i32) -> (i32, i32) {
    %c0_i32 = arith.constant 0 : i32
    %c0_i32_0 = arith.constant 0 : i32
    %c0_i32_1 = arith.constant 0 : i32
    return %c0_i32, %c0_i32_0 : i32, i32
  }
  func.func @transform_12(%arg0: i32, %arg1: i32) -> (i32, i32) {
    %c0_i32 = arith.constant 0 : i32
    %c0_i32_0 = arith.constant 0 : i32
    %c0_i32_1 = arith.constant 0 : i32
    return %c0_i32, %c0_i32_0 : i32, i32
  }
  func.func @transform_13(%arg0: i32, %arg1: i32) -> (i32, i32) {
    %c0_i32 = arith.constant 0 : i32
    %c0_i32_0 = arith.constant 0 : i32
    %c0_i32_1 = arith.constant 0 : i32
    return %c0_i32, %c0_i32_0 : i32, i32
  }
  func.func @transform_14(%arg0: i32, %arg1: i32) -> (i32, i32, i32) {
    %c0_i32 = arith.constant 0 : i32
    %c0_i32_0 = arith.constant 0 : i32
    %c0_i32_1 = arith.constant 0 : i32
    return %arg0, %c0_i32, %c0_i32_0 : i32, i32, i32
  }
}

</mosaic_0001>

<bundles_post_ra>
// kernel: tpu_custom_call.1
= control target key start
LH: loop header
LB: loop body
LE: loop exit
PB: predicated region body
PF: predicated region fallthrough
CT: control target
= control target key end

     0   :  { %s4568_s0 = inlined_call_operand.hbm [shape: f32[2,8,128], index: 0, kind: input, shape index: {}]   ;;  %s4569_s1 = inlined_call_operand.vmem [shape: f32[2,1,8], index: 1, kind: input, shape index: {}]   ;;  %s4570_s2 = inlined_call_operand.hbm [shape: bf16[128,384], index: 2, kind: input, shape index: {}]   ;;  %s4571_s3 = inlined_call_operand.hbm [shape: f32[1,384], index: 3, kind: input, shape index: {}]   ;;  %s4572_s4 = inlined_call_operand.hbm [shape: bf16[128,128], index: 4, kind: input, shape index: {}]   ;;  %s4573_s5 = inlined_call_operand.hbm [shape: f32[1,128], index: 5, kind: input, shape index: {}]   ;;  %s4574_s6 = inlined_call_operand.hbm [shape: bf16[128,512], index: 6, kind: input, shape index: {}]   ;;  %s4575_s7 = inlined_call_operand.hbm [shape: f32[1,512], index: 7, kind: input, shape index: {}]   ;;  %s4576_s8 = inlined_call_operand.hbm [shape: bf16[512,128], index: 8, kind: input, shape index: {}]   ;;  %s4577_s9 = inlined_call_operand.hbm [shape: f32[1,128], index: 9, kind: input, shape index: {}]   ;;  %s4578_s10 = inlined_call_operand.vmem [shape: f32[8,128], index: 10, kind: input, shape index: {}]   ;;  %s4579_s11 = inlined_call_operand.vmem [shape: f32[8,128], index: 11, kind: input, shape index: {}]   ;;  %s4580_s12 = inlined_call_operand.vmem [shape: f32[8,128], index: 12, kind: input, shape index: {}]   ;;  %s4581_s13 = inlined_call_operand.vmem [shape: f32[8,128], index: 13, kind: input, shape index: {}]   ;;  %s4582_s14 = inlined_call_operand.hbm [shape: f32[2,8,128], index: 14, kind: output, shape index: {}]  }
   0x1   :  { %4614 = sst [smem:[#allocation37_spill]] %s4568_s0 }
   0x2   :  { %4615 = sst [smem:[#allocation38_spill]] %s4569_s1 }
   0x3   :  { %4616 = sst [smem:[#allocation39_spill]] %s4570_s2 }
   0x4   :  { %4617 = sst [smem:[#allocation40_spill]] %s4571_s3 }
   0x5   :  { %4618 = sst [smem:[#allocation41_spill]] %s4572_s4 }
   0x6   :  { %4619 = sst [smem:[#allocation42_spill]] %s4573_s5 }
   0x7   :  { %4620 = sst [smem:[#allocation43_spill]] %s4574_s6 }
   0x8   :  { %4621 = sst [smem:[#allocation44_spill]] %s4575_s7 }
   0x9   :  { %4622 = sst [smem:[#allocation45_spill]] %s4576_s8 }
   0xa   :  { %4623 = sst [smem:[#allocation46_spill]] %s4577_s9 }
   0xb   :  { %4624 = sst [smem:[#allocation47_spill]] %s4578_s10 }
   0xc   :  { %4625 = sst [smem:[#allocation48_spill]] %s4579_s11 }
   0xd   :  { %4626 = sst [smem:[#allocation49_spill]] %s4580_s12 }
   0xe   :  { %4627 = sst [smem:[#allocation50_spill]] %s4581_s13 }
   0xf   :  { %4628 = sst [smem:[#allocation51_spill]] %s4582_s14 }
  0x10   :  { %19 = vsyncpa [#allocation5], 0 }
  0x11   :  { %21 = vsyncpa [#allocation5 + $0x1], 0 }
  0x12   :  { %22 = vsyncpa [#allocation8], 0 }
  0x13   :  { %23 = vsyncpa [#allocation11], 0 }
  0x14   :  { %24 = vsyncpa [#allocation14], 0 }
  0x15   :  { %26 = vsyncpa [#allocation14 + $0x1], 0 }
  0x16   :  { %27 = vsyncpa [#allocation17], 0 }
  0x17   :  { %29 = vsyncpa [#allocation17 + $0x1], 0 }
  0x18   :  { %30 = vsyncpa [#allocation6], 0 }
  0x19   :  { %32 = vsyncpa [#allocation6 + $0x1], 0  ;;  %s3801_s29 = smov 0   ;;  %s3803_s30 = smov 0  }
  0x1a   :  { %s3805_s15 = smov 0   ;;  %s3807_s16 = smov 0  }
  0x1b   :  { %s3809_s17 = smov 0   ;;  %s3811_s18 = smov 0  }
  0x1c   :  { %s3813_s19 = smov 0   ;;  %s3815_s20 = smov 0  }
  0x1d   :  { %s3817_s21 = smov 0   ;;  %s3819_s22 = smov 0  }
  0x1e   :  { %s3821_s23 = smov 0  }
  0x1f LB: > { %4629 = sst [smem:[#allocation27_spill]] %s3662_s30  ;;  %s3857_s24 = sadd.s32 4294967295, %s3698_s23   ;;  %s3698_s23 = sphi %s3821_s23, %s38_s23   ;;  %s3694_s22 = sphi %s3819_s22, %s4703_s22   ;;  %s3690_s21 = sphi %s3817_s21, %s4709_s21   ;;  %s3686_s20 = sphi %s3815_s20, %s4701_s20   ;;  %s3682_s19 = sphi %s3813_s19, %s4708_s19   ;;  %s3678_s18 = sphi %s3811_s18, %s4700_s18   ;;  %s3674_s17 = sphi %s3809_s17, %s4707_s17   ;;  %s3670_s16 = sphi %s3807_s16, %s4706_s16   ;;  %s3666_s15 = sphi %s3805_s15, %s4705_s15   ;;  %s3662_s30 = sphi %s3803_s30, %s4704_s30   ;;  %s3658_s29 = sphi %s3801_s29, %s4698_s29  }
  0x20   : > { %4630 = sst [smem:[#allocation28_spill]] %s3678_s18  ;;  %p2739_p0 = scmp.ge.s32.totalorder %s3698_s23, 1 }
  0x21   : > { %4631 = sst [smem:[#allocation29_spill]] %s3682_s19  ;;  %p4585_p1 = scmp.eq.s32.totalorder %s3857_s24, 0 }
  0x22   : > { %4632 = sst [smem:[#allocation30_spill]] %s3686_s20  ;;  %p400_p2 = scmp.lt.s32.totalorder %s3698_s23, 5 }
  0x23   : > { %4633 = sst [smem:[#allocation31_spill]] %s3694_s22  ;;  %s3700_s26 = smov [#allocation7]  }
  0x24   : > { %p3862_p3 = pnand %p2739_p0, %p400_p2  ;;  %s412_s27 = sshll.u32 %s3700_s26, 4  ;;  %s413_s27 = int_to_ptr.vmem [resolvable:$true] %s412_s27 }
  0x25   : > { %s3701_s14 = smov [#allocation10]   ;;  %s4637_s2 = sld [smem:[#allocation39_spill]] }
  0x26   : > { %s4634_s25 = scalar_select %p3862_p3, 1, 0 }
  0x27   : > { %p3042_p4 = pneg %p3862_p3  ;;  %s436_s13 = sshll.u32 %s3701_s14, 4  ;;  %s3874_s13 = int_to_ptr.vmem [resolvable:$true] %s436_s13 }
  0x28   : > { %4635 = sst [smem:[#allocation32_spill]] %s4634_s25 }
  0x29   : > { %p3870_p5 = pnand %p3042_p4, %p4585_p1 }
  0x2b   : > { %s4636_s28 = scalar_select %p3870_p5, 1, 0 }
  0x2c   : > { %s3296_s10 = scalar_lea.hbm %s4637_s2, 3072  ;;  %p3884_p7 = pneg %p3870_p5 }
  0x2d   : > { %p3297_p6 = scmp.ne.s32.totalorder %s4637_s2, %s3296_s10  ;;  %p3303_p10 = scmp.lt.u32.totalorder %s3296_s10, %s4637_s2 }
  0x2e   : > { %s4638_s26 = scalar_select %p3884_p7, 1, 0 }
  0x2f   : > { %p3299_p8 = pnand %p3884_p7, %p3297_p6 }
  0x31   : > { %p3300_p9 = pneg %p3299_p8 }
  0x33   : > { %p3305_p11 = pnand %p3303_p10, %p3300_p9 }
  0x35   : > { %3308 = shalt.err (!%p3305_p11)
}
  0x36   : > { %s3309_s11 = scalar_lea.vmem %s413_s27, 3072  ;;  %p3317_p2 = scmp.lt.s32.totalorder %s413_s27, %s413_s27 }
  0x37   : > { %p3310_p12 = scmp.ne.s32.totalorder %s413_s27, %s3309_s11  ;;  %p3318_p4 = scmp.lt.s32.totalorder %s3309_s11, %s3309_s11 }
  0x39   : > { %p3312_p13 = pnand %p3310_p12, %p3884_p7  ;;  %p3319_p1 = por %p3318_p4, %p3317_p2 }
  0x3b   : > { %p3313_p0 = pneg %p3312_p13 }
  0x3d   : > { %p3320_p3 = pnand %p3319_p1, %p3313_p0 }
  0x3f   : > { %3323 = shalt.err (!%p3320_p3)
}
  0x40   : > { %s3702_s1 = smov 192   ;;  %s3703_s12 = smov 12  }
  0x41   : > { %3045 = dma.hbm_to_vmem [thread:$0]  (!%p3870_p5), %s4637_s2, 3072, %s413_s27, [#allocation8], %s3702_s1, %s3702_s1, %s3703_s12  }
  0x42   : > { %s4639_s4 = sld [smem:[#allocation41_spill]] }
  0x48   : > { %s3324_s25 = scalar_lea.hbm %s4639_s4, 1024 }
  0x49   : > { %p3325_p6 = scmp.ne.s32.totalorder %s4639_s4, %s3324_s25  ;;  %p3331_p8 = scmp.lt.u32.totalorder %s3324_s25, %s4639_s4 }
  0x4b   : > { %p3327_p1 = pnand %p3325_p6, %p3884_p7 }
  0x4d   : > { %p3328_p3 = pneg %p3327_p1 }
  0x4f   : > { %p3333_p9 = pnand %p3331_p8, %p3328_p3 }
  0x51   : > { %3336 = shalt.err (!%p3333_p9)
}
  0x52   : > { %s3337_s27 = scalar_lea.vmem %s3874_s13, 1024  ;;  %p3345_p13 = scmp.lt.s32.totalorder %s3874_s13, %s3874_s13 }
  0x53   : > { %p3338_p10 = scmp.ne.s32.totalorder %s3874_s13, %s3337_s27  ;;  %p3346_p0 = scmp.lt.s32.totalorder %s3337_s27, %s3337_s27 }
  0x55   : > { %p3340_p11 = pnand %p3338_p10, %p3884_p7  ;;  %p3347_p2 = por %p3346_p0, %p3345_p13 }
  0x57   : > { %p3341_p12 = pneg %p3340_p11 }
  0x59   : > { %p3348_p4 = pnand %p3347_p2, %p3341_p12 }
  0x5b   : > { %3351 = shalt.err (!%p3348_p4)
}
  0x5c   : > { %s4591_s7 = smov 64   ;;  %s4592_s0 = smov 4  }
  0x5d   : > { %3051 = dma.hbm_to_vmem [thread:$0]  (!%p3870_p5), %s4639_s4, 1024, %s3874_s13, [#allocation11], %s4591_s7, %s4591_s7, %s4592_s0  }
  0x5e   : > { %s3706_s1 = smov [#allocation18]   ;;  %s4640_s9 = sld [smem:[#allocation46_spill]] }
  0x5f   : > { %s461_s12 = sshll.u32 %s3706_s1, 4  ;;  %s462_s12 = int_to_ptr.vmem [resolvable:$true] %s461_s12 }
  0x64   : > { %s3352_s20 = scalar_lea.hbm %s4640_s9, 16 }
  0x65   : > { %p3353_p6 = scmp.ne.s32.totalorder %s4640_s9, %s3352_s20  ;;  %p3359_p8 = scmp.lt.u32.totalorder %s3352_s20, %s4640_s9 }
  0x67   : > { %p3355_p1 = pnand %p3353_p6, %p3884_p7 }
  0x69   : > { %p3356_p3 = pneg %p3355_p1 }
  0x6b   : > { %p3361_p9 = pnand %p3359_p8, %p3356_p3 }
  0x6d   : > { %3364 = shalt.err (!%p3361_p9)
}
  0x6e   : > { %s3365_s13 = scalar_lea.vmem %s462_s12, 16  ;;  %s3372_s8 = scalar_lea.vmem %s462_s12, 32 }
  0x6f   : > { %p3366_p10 = scmp.ne.s32.totalorder %s462_s12, %s3365_s13  ;;  %p3373_p13 = scmp.lt.s32.totalorder %s462_s12, %s462_s12 }
  0x70   : > { %p3374_p0 = scmp.lt.s32.totalorder %s3372_s8, %s3365_s13 }
  0x71   : > { %p3368_p11 = pnand %p3366_p10, %p3884_p7 }
  0x72   : > { %p3375_p2 = por %p3374_p0, %p3373_p13 }
  0x73   : > { %p3369_p12 = pneg %p3368_p11 }
  0x75   : > { %p3376_p4 = pnand %p3375_p2, %p3369_p12 }
  0x77   : > { %3379 = shalt.err (!%p3376_p4)
}
  0x78   : > { %3057 = dma.hbm_to_vmem [thread:$0]  (!%p3870_p5), %s4640_s9, 16, %s462_s12, [#allocation17]  }
  0x79   : > { %p4595_p6 = scmp.eq.s32.totalorder %s3698_s23, 0  ;;  %p200_p1 = scmp.ne.s32.totalorder %s3666_s15, %s3662_s30 }
  0x7a   : > { %p206_p3 = scmp.ne.s32.totalorder %s3662_s30, %s3658_s29  ;;  %p4594_p8 = scmp.lt.s32.totalorder %s3698_s23, 4 }
  0x7b   : > { %p202_p9 = por %p200_p1, %p4595_p6  ;;  %s4596_s19 = sand.u32 1, %s3698_s23  }
  0x7c   : > { %p4641_p10 = scmp.eq.s32.totalorder %s3857_s24, 0  ;;  %s4593_s20 = sand.u32 1, %s3666_s15  }
  0x7d   : > { %s2857_s14 = sshll.u32 %s3690_s21, 7  ;;  %s3964_s11 = sshll.u32 %s4593_s20, 7 }
  0x7e   : > { %p3956_p11 = por %p206_p3, %p4641_p10  ;;  %s4644_s6 = sld [smem:[#allocation43_spill]] }
  0x7f   : > { %p3973_p12 = pnand %p4594_p8, %p202_p9  ;;  %s512_s8 = scalar_lea.vmem [#allocation13], %s3964_s11 }
  0x80   : > { %s4642_s10 = scalar_select %p3956_p11, 1, 0 }
  0x81   : > { %s4645_s29 = scalar_select %p3973_p12, 1, 0 }
  0x82   : > { %4643 = sst [smem:[#allocation33_spill]] %s4642_s10  ;;  %s519_s25 = sshll.u32 %s512_s8, 4  ;;  %s3978_s25 = int_to_ptr.vmem [resolvable:$true] %s519_s25 }
  0x83   : > { %s3982_s1 = scalar_lea.sflag [#allocation14], %s4596_s19  ;;  %p3988_p0 = pneg %p3973_p12 }
  0x84   : > { %s3969_s13 = scalar_lea.hbm %s4644_s6, %s2857_s14  ;;  %s3385_s8 = scalar_lea.hbm %s4644_s6, 4096 }
  0x85   : > { %s3380_s12 = scalar_lea.hbm %s3969_s13, 2048  ;;  %p3386_p1 = scmp.lt.u32.totalorder %s3969_s13, %s4644_s6 }
  0x86   : > { %p3381_p13 = scmp.ne.s32.totalorder %s3969_s13, %s3380_s12  ;;  %p3387_p3 = scmp.lt.u32.totalorder %s3385_s8, %s3380_s12 }
  0x87   : > { %p3389_p10 = scmp.lt.u32.totalorder %s3380_s12, %s3969_s13 }
  0x88   : > { %p3383_p2 = pnand %p3988_p0, %p3381_p13  ;;  %p3388_p9 = por %p3387_p3, %p3386_p1 }
  0x8a   : > { %p3384_p4 = pneg %p3383_p2  ;;  %p3390_p8 = por %p3389_p10, %p3388_p9 }
  0x8c   : > { %p3391_p6 = pnand %p3390_p8, %p3384_p4 }
  0x8e   : > { %3394 = shalt.err (!%p3391_p6)
}
  0x8f   : > { %s3395_s19 = scalar_lea.vmem %s3978_s25, 2048  ;;  %s3707_s7 = smov [#allocation13]  }
  0x90   : > { %p3396_p13 = scmp.ne.s32.totalorder %s3978_s25, %s3395_s19  ;;  %s3400_s27 = sshll.u32 %s3707_s7, 4  ;;  %s3401_s27 = int_to_ptr.vmem [resolvable:$false] %s3400_s27 }
  0x91   : > { %s3402_s0 = scalar_lea.vmem %s3401_s27, 4096  ;;  %p3403_p5 = scmp.lt.s32.totalorder %s3978_s25, %s3401_s27 }
  0x92   : > { %p3398_p2 = pnand %p3396_p13, %p3988_p0  ;;  %p3404_p7 = scmp.lt.s32.totalorder %s3402_s0, %s3395_s19 }
  0x94   : > { %p3399_p11 = pneg %p3398_p2  ;;  %p3405_p1 = por %p3404_p7, %p3403_p5 }
  0x96   : > { %p3406_p3 = pnand %p3405_p1, %p3399_p11 }
  0x98   : > { %3409 = shalt.err (!%p3406_p3)
}
  0x99   : > { %s3708_s20 = smov 256   ;;  %s3709_s12 = smov 128  }
  0x9a   : > { %s3710_s8 = smov 8   ;;  %s3711_s2 = smov [#allocation9]  }
  0x9b   : > { %3064 = dma.hbm_to_vmem [thread:$0]  (!%p3973_p12), %s3969_s13, 2048, %s3978_s25, %s3982_s1, %s3708_s20, %s3709_s12, %s3710_s8  }
  0x9c   : > { %s426_s4 = sshll.u32 %s3711_s2, 4  ;;  %s3712_s7 = smov [#allocation12]   ;;  %s427_s4 = int_to_ptr.vmem [resolvable:$true] %s426_s4 }
  0x9d   : > { %s450_s6 = sshll.u32 %s3712_s7, 4  ;;  %s4647_s3 = sld [smem:[#allocation40_spill]]  ;;  %s4012_s6 = int_to_ptr.vmem [resolvable:$true] %s450_s6 }
  0x9e   : > { %p4648_p7 = scmp.ne.s32.totalorder %s4638_s26, 0 }
  0xa3   : > { %s3410_s0 = scalar_lea.hbm %s4647_s3, 48 }
  0xa4   : > { %p3411_p5 = scmp.ne.s32.totalorder %s4647_s3, %s3410_s0  ;;  %p3417_p11 = scmp.lt.u32.totalorder %s3410_s0, %s4647_s3 }
  0xa6   : > { %p3413_p6 = pnand %p3411_p5, %p4648_p7 }
  0xa8   : > { %p3414_p8 = pneg %p3413_p6 }
  0xaa   : > { %p3419_p4 = pnand %p3417_p11, %p3414_p8 }
  0xac   : > { %3422 = shalt.err (!%p3419_p4)
}
  0xad   : > { %s3423_s2 = scalar_lea.vmem %s427_s4, 48  ;;  %s3430_s25 = scalar_lea.vmem %s427_s4, 64 }
  0xae   : > { %p3424_p9 = scmp.ne.s32.totalorder %s427_s4, %s3423_s2  ;;  %p3431_p2 = scmp.lt.s32.totalorder %s427_s4, %s427_s4 }
  0xaf   : > { %p3432_p1 = scmp.lt.s32.totalorder %s3430_s25, %s3423_s2 }
  0xb0   : > { %p3426_p10 = pnand %p3424_p9, %p4648_p7 }
  0xb1   : > { %p3433_p3 = por %p3432_p1, %p3431_p2 }
  0xb2   : > { %p3427_p13 = pneg %p3426_p10 }
  0xb4   : > { %p3434_p12 = pnand %p3433_p3, %p3427_p13 }
  0xb6   : > { %3437 = shalt.err (!%p3434_p12)
}
  0xb7   : > { %p4649_p5 = scmp.ne.s32.totalorder %s4636_s28, 0  ;;  %s4650_s5 = sld [smem:[#allocation42_spill]] }
  0xb9   : > { %3048 = dma.hbm_to_vmem [thread:$0]  (!%p4649_p5), %s4647_s3, 48, %s427_s4, [#allocation8]  }
  0xbd   : > { %s3438_s12 = scalar_lea.hbm %s4650_s5, 16 }
  0xbe   : > { %p3439_p6 = scmp.ne.s32.totalorder %s4650_s5, %s3438_s12  ;;  %p3445_p12 = scmp.lt.u32.totalorder %s3438_s12, %s4650_s5 }
  0xc0   : > { %p3441_p8 = pnand %p3439_p6, %p4648_p7 }
  0xc2   : > { %p3442_p11 = pneg %p3441_p8 }
  0xc4   : > { %p3447_p4 = pnand %p3445_p12, %p3442_p11 }
  0xc6   : > { %3450 = shalt.err (!%p3447_p4)
}
  0xc7   : > { %s3451_s4 = scalar_lea.vmem %s4012_s6, 16  ;;  %s3458_s0 = scalar_lea.vmem %s4012_s6, 32 }
  0xc8   : > { %p3452_p9 = scmp.ne.s32.totalorder %s4012_s6, %s3451_s4  ;;  %p3459_p2 = scmp.lt.s32.totalorder %s4012_s6, %s4012_s6 }
  0xc9   : > { %p3460_p1 = scmp.lt.s32.totalorder %s3458_s0, %s3451_s4 }
  0xca   : > { %p3454_p10 = pnand %p3452_p9, %p4648_p7 }
  0xcb   : > { %p3461_p3 = por %p3460_p1, %p3459_p2 }
  0xcc   : > { %p3455_p13 = pneg %p3454_p10 }
  0xce   : > { %p3462_p6 = pnand %p3461_p3, %p3455_p13 }
  0xd0   : > { %3465 = shalt.err (!%p3462_p6)
}
  0xd1   : > { %3054 = dma.hbm_to_vmem [thread:$0]  (!%p4649_p5), %s4650_s5, 16, %s4012_s6, [#allocation11]  }
  0xd2   : > { %s2738_s28 = sadd.s32 4294967294, %s3698_s23   ;;  %s47_s26 = sadd.s32 1, %s3690_s21 }
  0xd3   : > { %p48_p7 = scmp.ge.s32.totalorder %s47_s26, 2  ;;  %s50_s25 = sadd.s32 1, %s3694_s22 }
  0xd4   : > { %s57_s9 = sadd.s32 1, %s3678_s18  ;;  %p64_p8 = scmp.ne.s32.totalorder %s3678_s18, %s3674_s17 }
  0xd5   : > { %s4711_s26 = smov (%p48_p7, %s47_s26), 0  ;;  %s4713_s25 = smov (!%p48_p7, %s50_s25), %s3694_s22 }
  0xd6   : > { %4651 = sst [smem:[#allocation34_spill]] %s4711_s26  ;;  %p4652_p5 = scmp.eq.s32.totalorder %s3698_s23, 0 }
  0xd7   : > { %p70_p12 = scmp.ne.s32.totalorder %s3674_s17, %s3670_s16  ;;  %p52_p4 = scmp.ge.s32.totalorder %s4713_s25, 2 }
  0xd8   : > { %p4070_p11 = por %p4652_p5, %p64_p8  ;;  %s190_s10 = ssub.s32 %s3690_s21, %s4711_s26 }
  0xd9   : > { %p4654_p9 = scmp.eq.s32.totalorder %s3857_s24, 0  ;;  %p191_p13 = scmp.eq.s32.totalorder %s190_s10, 0 }
  0xda   : > { %s4715_s25 = smov (%p52_p4, %s4713_s25), 0  ;;  %s4657_s20 = sadd.s32 1, %s3666_s15 }
  0xdb   : > { %p4083_p10 = por %p4654_p9, %p70_p12  ;;  %4656 = sst [smem:[#allocation35_spill]] %s4715_s25 }
  0xdc   : > { %s4092_s12 = scalar_select %p191_p13, %s3666_s15, %s4657_s20  }
  0xdd   : > { %s4655_s30 = scalar_select %p4083_p10, 1, 0 }
  0xde   : > { %s54_s8 = ssub.s32 %s3694_s22, %s4715_s25  ;;  %p387_p2 = scmp.eq.s32.totalorder %s3857_s24, 3 }
  0xdf   : > { %p55_p1 = scmp.eq.s32.totalorder %s54_s8, 0  ;;  %p393_p3 = scmp.eq.s32.totalorder %s2738_s28, 3 }
  0xe0   : > { %p4100_p6 = por %p387_p2, %p64_p8  ;;  %s484_s19 = sand.u32 1, %s3678_s18  }
  0xe1   : > { %s4106_s27 = scalar_select %p55_p1, %s3678_s18, %s57_s9  }
  0xe2   : > { %s4658_s7 = scalar_select %p4100_p6, 1, 0 }
  0xe3   : > { %4659 = sst [smem:[#allocation36_spill]] %s4106_s27  ;;  %p4111_p7 = por %p393_p3, %p70_p12 }
  0xe4   : > { %s2746_s0 = sshll.u32 %s484_s19, 3  ;;  %s2747_s13 = sshll.u32 %s3694_s22, 7 }
  0xe5   : > { %s4660_s4 = scalar_select %p4111_p7, 1, 0 }
  0xe6   : > { %s4661_s20 = sld [smem:[#allocation37_spill]]  ;;  %s488_s28 = scalar_lea.vmem [#allocation4], %s2746_s0 }
  0xe7   : > { %s495_s5 = sshll.u32 %s488_s28, 4  ;;  %p4663_p8 = scmp.lt.s32.totalorder %s3698_s23, 4  ;;  %s4129_s5 = int_to_ptr.vmem [resolvable:$true] %s495_s5 }
  0xe8   : > { %s4665_s25 = sand.u32 1, %s3666_s15  }
  0xe9   : > { %p4125_p5 = pnand %p4663_p8, %p4070_p11  ;;  %s4133_s2 = sshll.u32 %s4665_s25, 1 }
  0xeb   : > { %p3468_p4 = pneg %p4125_p5 }
  0xec   : > { %s4662_s3 = smov %s4661_s20  ;;  %s4119_s8 = scalar_lea.hbm %s4661_s20, %s2747_s13 }
  0xed   : > { %s485_s13 = scalar_lea.sflag [#allocation5], %s484_s19  ;;  %s3466_s10 = scalar_lea.hbm %s4119_s8, 128 }
  0xee   : > { %p3467_p12 = scmp.ne.s32.totalorder %s4119_s8, %s3466_s10  ;;  %s3471_s20 = scalar_lea.hbm %s4662_s3, 256 }
  0xef   : > { %p3472_p11 = scmp.lt.u32.totalorder %s4119_s8, %s4662_s3  ;;  %p3473_p2 = scmp.lt.u32.totalorder %s3471_s20, %s3466_s10 }
  0xf0   : > { %p3469_p9 = pnand %p3468_p4, %p3467_p12  ;;  %p3475_p3 = scmp.lt.u32.totalorder %s3466_s10, %s4119_s8 }
  0xf1   : > { %p3474_p1 = por %p3473_p2, %p3472_p11 }
  0xf2   : > { %p3470_p13 = pneg %p3469_p9 }
  0xf3   : > { %p3476_p8 = por %p3475_p3, %p3474_p1 }
  0xf5   : > { %p3477_p7 = pnand %p3476_p8, %p3470_p13 }
  0xf7   : > { %3480 = shalt.err (!%p3477_p7)
}
  0xf8   : > { %s3481_s25 = scalar_lea.vmem %s4129_s5, 128  ;;  %s3713_s19 = smov [#allocation4]  }
  0xf9   : > { %p3482_p12 = scmp.ne.s32.totalorder %s4129_s5, %s3481_s25  ;;  %s3486_s6 = sshll.u32 %s3713_s19, 4  ;;  %s3487_s6 = int_to_ptr.vmem [resolvable:$false] %s3486_s6 }
  0xfa   : > { %s3488_s26 = scalar_lea.vmem %s3487_s6, 256  ;;  %p3489_p10 = scmp.lt.s32.totalorder %s4129_s5, %s3487_s6 }
  0xfb   : > { %p3484_p9 = pnand %p3482_p12, %p3468_p4  ;;  %p3490_p11 = scmp.lt.s32.totalorder %s3488_s26, %s3481_s25 }
  0xfd   : > { %p3485_p6 = pneg %p3484_p9  ;;  %p3491_p2 = por %p3490_p11, %p3489_p10 }
  0xff   : > { %p3492_p1 = pnand %p3491_p2, %p3485_p6 }
 0x101   : > { %3495 = shalt.err (!%p3492_p1)
}
 0x102   : > { %3061 = dma.hbm_to_vmem [thread:$0]  (!%p4125_p5), %s4119_s8, 128, %s4129_s5, %s485_s13  }
 0x103   : > { %s2858_s10 = sshll.u32 %s3690_s21, 5  ;;  %s533_s0 = scalar_lea.vmem [#allocation15], %s4133_s2 }
 0x104   : > { %s541_s20 = sshll.u32 %s533_s0, 4  ;;  %s4666_s3 = sld [smem:[#allocation44_spill]]  ;;  %s542_s20 = int_to_ptr.vmem [resolvable:$true] %s541_s20 }
 0x10a   : > { %s539_s22 = scalar_lea.hbm %s4666_s3, %s2858_s10  ;;  %s3501_s26 = scalar_lea.hbm %s4666_s3, 64 }
 0x10b   : > { %s3496_s25 = scalar_lea.hbm %s539_s22, 32  ;;  %p3502_p5 = scmp.lt.u32.totalorder %s539_s22, %s4666_s3 }
 0x10c   : > { %p3497_p10 = scmp.ne.s32.totalorder %s539_s22, %s3496_s25  ;;  %p3503_p4 = scmp.lt.u32.totalorder %s3501_s26, %s3496_s25 }
 0x10d   : > { %p3505_p3 = scmp.lt.u32.totalorder %s3496_s25, %s539_s22 }
 0x10e   : > { %p3499_p6 = pnand %p3497_p10, %p3988_p0  ;;  %p3504_p13 = por %p3503_p4, %p3502_p5 }
 0x110   : > { %p3500_p7 = pneg %p3499_p6  ;;  %p3506_p8 = por %p3505_p3, %p3504_p13 }
 0x112   : > { %p3507_p12 = pnand %p3506_p8, %p3500_p7 }
 0x114   : > { %3510 = shalt.err (!%p3507_p12)
}
 0x115   : > { %s3511_s5 = scalar_lea.vmem %s542_s20, 32  ;;  %s3714_s8 = smov [#allocation15]  }
 0x116   : > { %p3512_p9 = scmp.ne.s32.totalorder %s542_s20, %s3511_s5  ;;  %s3516_s2 = sshll.u32 %s3714_s8, 4  ;;  %s3517_s2 = int_to_ptr.vmem [resolvable:$false] %s3516_s2 }
 0x117   : > { %s3518_s13 = scalar_lea.vmem %s3517_s2, 64  ;;  %p3519_p1 = scmp.lt.s32.totalorder %s542_s20, %s3517_s2 }
 0x118   : > { %p3514_p11 = pnand %p3512_p9, %p3988_p0  ;;  %p3520_p10 = scmp.lt.s32.totalorder %s3518_s13, %s3511_s5 }
 0x11a   : > { %p3515_p2 = pneg %p3514_p11  ;;  %p3521_p6 = por %p3520_p10, %p3519_p1 }
 0x11c   : > { %p3522_p4 = pnand %p3521_p6, %p3515_p2 }
 0x11e   : > { %3525 = shalt.err (!%p3522_p4)
}
 0x11f   : > { %p4667_p5 = scmp.ne.s32.totalorder %s4645_s29, 0  ;;  %s2859_s18 = sshll.u32 %s3690_s21, 11 }
 0x120   : > { %s552_s27 = scalar_lea.vmem [#allocation16], %s3964_s11  ;;  %s4668_s19 = sld [smem:[#allocation45_spill]] }
 0x121   : > { %3067 = dma.hbm_to_vmem [thread:$0]  (!%p4667_p5), %s539_s22, 32, %s542_s20, %s3982_s1  }
 0x122   : > { %s559_s10 = sshll.u32 %s552_s27, 4  ;;  %s4670_s6 = sand.u32 1, %s3698_s23   ;;  %s4185_s10 = int_to_ptr.vmem [resolvable:$true] %s559_s10 }
 0x123   : > { %s4189_s26 = scalar_lea.sflag [#allocation17], %s4670_s6 }
 0x126   : > { %s4669_s25 = smov %s4668_s19  ;;  %s4183_s9 = scalar_lea.hbm %s4668_s19, %s2859_s18 }
 0x127   : > { %s3526_s5 = scalar_lea.hbm %s4183_s9, 2048  ;;  %s3531_s1 = scalar_lea.hbm %s4669_s25, 4096 }
 0x128   : > { %p3527_p7 = scmp.ne.s32.totalorder %s4183_s9, %s3526_s5  ;;  %p3532_p8 = scmp.lt.u32.totalorder %s4183_s9, %s4669_s25 }
 0x129   : > { %p3533_p12 = scmp.lt.u32.totalorder %s3531_s1, %s3526_s5  ;;  %p3535_p11 = scmp.lt.u32.totalorder %s3526_s5, %s4183_s9 }
 0x12a   : > { %p3529_p13 = pnand %p3527_p7, %p3988_p0 }
 0x12b   : > { %p3534_p9 = por %p3533_p12, %p3532_p8 }
 0x12c   : > { %p3530_p3 = pneg %p3529_p13 }
 0x12d   : > { %p3536_p2 = por %p3535_p11, %p3534_p9 }
 0x12f   : > { %p3537_p1 = pnand %p3536_p2, %p3530_p3 }
 0x131   : > { %3540 = shalt.err (!%p3537_p1)
}
 0x132   : > { %s3541_s2 = scalar_lea.vmem %s4185_s10, 2048  ;;  %s3715_s13 = smov [#allocation16]  }
 0x133   : > { %p3542_p10 = scmp.ne.s32.totalorder %s4185_s10, %s3541_s2  ;;  %s3546_s18 = sshll.u32 %s3715_s13, 4  ;;  %s3547_s18 = int_to_ptr.vmem [resolvable:$false] %s3546_s18 }
 0x134   : > { %s3548_s27 = scalar_lea.vmem %s3547_s18, 4096  ;;  %p3549_p7 = scmp.lt.s32.totalorder %s4185_s10, %s3547_s18 }
 0x135   : > { %p3544_p6 = pnand %p3542_p10, %p3988_p0  ;;  %p3550_p13 = scmp.lt.s32.totalorder %s3548_s27, %s3541_s2 }
 0x137   : > { %p3545_p4 = pneg %p3544_p6  ;;  %p3551_p8 = por %p3550_p13, %p3549_p7 }
 0x139   : > { %p3552_p12 = pnand %p3551_p8, %p3545_p4 }
 0x13b   : > { %3555 = shalt.err (!%p3552_p12)
}
 0x13c   : > { %s4671_s0 = smov 4   ;;  %s4672_s28 = smov 64  }
 0x13d   : > { %3070 = dma.hbm_to_vmem [thread:$0]  (!%p4667_p5), %s4183_s9, 2048, %s4185_s10, %s4189_s26, %s4672_s28, %s4672_s28, %s4671_s0  }
 0x13e   : > { %s4673_s14 = sld [smem:[#allocation32_spill]] }
 0x144   : > { %p4674_p0 = scmp.ne.s32.totalorder %s4673_s14, 0 }
 0x145   : > { %s4219_s19 = sand.u32 (!%p4674_p0), 1, %s3674_s17   ;;  %p4675_p3 = scmp.ne.s32.totalorder (!%p4674_p0), %s4655_s30, 0 }
 0x146   : > { %571 = sbr.rel (%p4674_p0) target bundleno = 2893 (0xb4d), region = 76  ;;  %s2758_s6 = sshll.u32 (!%p4674_p0), %s4219_s19, 3 }
 0x147   : > { %s574_s5 = scalar_lea.sflag (!%p4674_p0), [#allocation5], %s4219_s19  ;;  %s4223_s22 = scalar_lea.vmem (!%p4674_p0), [#allocation4], %s2758_s6 }
 0x14d   : > { %3629 = dma.done.wait (%p4675_p3), %s574_s5, 128  }
 0x14e   : > { %3631 = vsyncadd (%p4675_p3), %s574_s5, 4294967168  ;;  %p4676_p5 = scmp.eq.s32.totalorder %s3857_s24, 0 }
 0x150   : > { %3633 = dma.done.wait (%p4676_p5), [#allocation8], 3120   ;;  %p4677_p9 = pmov %p4676_p5 }
 0x151   : > { %p4678_p11 = pmov %p4676_p5 }
 0x152   : > { %3635 = vsyncadd (%p4677_p9), [#allocation8], 4294964176 }
 0x153   : > { %3637 = dma.done.wait (%p4678_p11), [#allocation11], 1040   ;;  %p4679_p2 = pmov %p4676_p5 }
 0x154   : > { %s4680_s29 = sld [smem:[#allocation27_spill]]  ;;  %s4681_s10 = sld [smem:[#allocation33_spill]] }
 0x155   : > { %3639 = vsyncadd (%p4679_p2), [#allocation11], 4294966256  ;;  %s598_s9 = sand.u32 1, %s3857_s24  }
 0x156   : > { %s599_s30 = scalar_lea.sflag [#allocation14], %s598_s9 }
 0x15a   : > { %s600_s26 = sand.u32 1, %s4680_s29   ;;  %p4682_p1 = scmp.ne.s32.totalorder %s4681_s10, 0 }
 0x15b   : > { %s2763_s11 = sshll.u32 %s600_s26, 7 }
 0x15c   : > { %s4239_s1 = scalar_lea.vmem [#allocation13], %s2763_s11 }
 0x15d   : > { %3641 = dma.done.wait (%p4682_p1), %s599_s30, 2080  }
 0x15e   : > { %3643 = vsyncadd (%p4682_p1), %s599_s30, 4294965216  ;;  %s4245_s20 = sshll.u32 %s600_s26, 1  ;;  %s617_s2 = scalar_lea.sflag [#allocation17], %s598_s9 }
 0x15f   : > { %s611_s8 = scalar_lea.vmem [#allocation15], %s4245_s20  ;;  %s4248_s13 = scalar_lea.vmem [#allocation16], %s2763_s11 }
 0x160   : > { %3645 = dma.done.wait (%p4682_p1), %s617_s2, 2048  }
 0x161   : > { %3647 = vsyncadd (%p4682_p1), %s617_s2, 4294965248  ;;  %p4683_p10 = pmov %p4679_p2 }
 0x162   : > { %p4684_p6 = pmov %p4679_p2 }
 0x163   : > { %3649 = dma.done.wait (%p4683_p10), [#allocation17], 16  }
 0x164   : > { %3651 = vsyncadd (%p4684_p6), [#allocation17], 4294967280  ;;  %s4685_s18 = sld [smem:[#allocation30_spill]]  ;;  %s4686_s28 = sld [smem:[#allocation38_spill]] }
 0x165   : > { %s4266_s5 = scalar_lea.vmem [#allocation19], %s2758_s6  ;;  %s4687_s29 = sld [smem:[#allocation29_spill]] }
 0x16a   : > { %p687_p4 = scmp.lt.s32.totalorder %s4685_s18, 1 }
 0x16b   : > { %p2768_p7 = scmp.ne.s32.totalorder %s4687_s29, 0 }
 0x16c   : > { %s4717_s18 = smov (!%p687_p4, %s4685_s18), 1  ;;  %v3196_v0 = vld [vmem:[#allocation7 + $0x4] ss:$12 sps:$4 sm:$0xff] (!%p2768_p7)   ;;  %v3198_v1 = vld [vmem:[#allocation7] ss:$12 sps:$4 sm:$0xff] (!%p2768_p7)   ;;  %v3716_v2 = vmov (!%p2768_p7), 0   ;;  %v734_v23 = vlaneseq (!%p2768_p7) }
 0x16d   : > { %s689_s14 = scalar_lea.vmem %s4686_s28, %s4717_s18  ;;  %697 = sbr.rel (%p2768_p7) target bundleno = 2151 (0x867), region = 116  ;;  %909 = vmatprep.mubr.bf16.mxu0 (!%p2768_p7), %v3716_v2  ;;  %877 = vmatprep.subr.bf16.mxu0 (!%p2768_p7), %v3196_v0  ;;  %v3199_v3 = vld [vmem:[#allocation7 + $0x1c] ss:$12 sps:$4 sm:$0xff] (!%p2768_p7)   ;;  %v3201_v4 = vld [vmem:[#allocation7 + $0x18] ss:$12 sps:$4 sm:$0xff] (!%p2768_p7)   ;;  %v3717_v20 = vmov (!%p2768_p7), 0.0  }
 0x16e   : > { %878 = vmatpush1.bf16.msra.mxu0 (!%p2768_p7), %v3198_v1  ;;  %v3202_v5 = vld [vmem:[#allocation7 + $0x34] ss:$12 sps:$4 sm:$0xff] (!%p2768_p7)   ;;  %v3204_v6 = vld [vmem:[#allocation7 + $0x30] ss:$12 sps:$4 sm:$0xff] (!%p2768_p7)   ;;  %v3205_v7 = vld [vmem:[#allocation7 + $0x4c] ss:$12 sps:$4 sm:$0xff] (!%p2768_p7)   ;;  %2916 = vmatprep.subr.bf16.mxu1 (!%p2768_p7), %v3717_v20 }
 0x16f   : > { %879 = vmatprep.subr.bf16.mxu0 (!%p2768_p7), %v3199_v3  ;;  %v3207_v8 = vld [vmem:[#allocation7 + $0x48] ss:$12 sps:$4 sm:$0xff] (!%p2768_p7)   ;;  %v3208_v9 = vld [vmem:[#allocation7 + $0x64] ss:$12 sps:$4 sm:$0xff] (!%p2768_p7)   ;;  %v3210_v10 = vld [vmem:[#allocation7 + $0x60] ss:$12 sps:$4 sm:$0xff] (!%p2768_p7)  }
 0x170   : > { %v3211_v11 = vld [vmem:[#allocation7 + $0x7c] ss:$12 sps:$4 sm:$0xff] (!%p2768_p7)   ;;  %v3213_v12 = vld [vmem:[#allocation7 + $0x78] ss:$12 sps:$4 sm:$0xff] (!%p2768_p7)   ;;  %v3214_v13 = vld [vmem:[#allocation7 + $0x94] ss:$12 sps:$4 sm:$0xff] (!%p2768_p7)  }
 0x171   : > { %v3216_v14 = vld [vmem:[#allocation7 + $0x90] ss:$12 sps:$4 sm:$0xff] (!%p2768_p7)   ;;  %v3217_v15 = vld [vmem:[#allocation7 + $0xac] ss:$12 sps:$4 sm:$0xff] (!%p2768_p7)   ;;  %v3219_v16 = vld [vmem:[#allocation7 + $0xa8] ss:$12 sps:$4 sm:$0xff] (!%p2768_p7)  }
 0x172   : > { %880 = vmatpush1.bf16.msra.mxu0 (!%p2768_p7), %v3201_v4  ;;  %v4270_v17 = vld [vmem:[%s4223_s22] sm:$0xff] (!%p2768_p7)  ;;  %2143 = vst [vmem:[#allocation3] sm:$0xff] (!%p2768_p7), %v3717_v20  ;;  %v3221_v21 = vld [vmem:[#allocation7 + $0x20] ss:$12 sps:$4 sm:$0xff] (!%p2768_p7)   ;;  %v4280_v25 = vshrl.u32 (!%p2768_p7), %v734_v23, 7  ;;  %s3718_s24 = smov (!%p2768_p7), 32  }
 0x173   : > { %881 = vmatprep.subr.bf16.mxu0 (!%p2768_p7), %v3202_v5  ;;  %v699_v18 = vpack.c.bf16 (!%p2768_p7), %v4270_v17, %v4270_v17  ;;  %v3220_v19 = vld [vmem:[#allocation7 + $0x8] ss:$12 sps:$4 sm:$0xff] (!%p2768_p7)   ;;  %v3222_v22 = vld [vmem:[#allocation7 + $0x38] ss:$12 sps:$4 sm:$0xff] (!%p2768_p7)   ;;  %v3223_v24 = vld [vmem:[#allocation7 + $0x50] ss:$12 sps:$4 sm:$0xff] (!%p2768_p7)  }
 0x174   : > { %2917 = vmatpush3.bf16.msra.mxu1 %v3220_v19  ;;  %v3224_v26 = vld [vmem:[#allocation7 + $0x68] ss:$12 sps:$4 sm:$0xff]   ;;  %v740_v27 = vsub.s32 1, %v4280_v25  ;;  %v4284_v28 = vld [vmem:[#allocation9] sm:$0x7]  ;;  %v736_v29 = vsub.s32 0, %v4280_v25 }
 0x175   : > { %2918 = vmatprep.subr.bf16.mxu1 %v3717_v20  ;;  %v3225_v31 = vld [vmem:[#allocation7 + $0x80] ss:$12 sps:$4 sm:$0xff]   ;;  %v3226_v37 = vld [vmem:[#allocation7 + $0x98] ss:$12 sps:$4 sm:$0xff]   ;;  %s3719_s6 = smov 96   ;;  %s3720_s22 = smov 64  }
 0x176   : > { %882 = vmatpush1.bf16.msra.mxu0 %v3204_v6  ;;  %v741_v30 = vrot.slane %v4284_v28, %v740_v27  ;;  %v737_v34 = vrot.slane %v4284_v28, %v736_v29  ;;  %v3227_v40 = vld [vmem:[#allocation7 + $0xb0] ss:$12 sps:$4 sm:$0xff]   ;;  %vm3721_vm0 = vmmov 0   ;;  %v3722_v41 = vmov 1983009808   ;;  %s4689_s27 = sld [smem:[#allocation47_spill]] }
 0x177   : > { %883 = vmatprep.subr.bf16.mxu0 %v3205_v7  ;;  %2932 = vmatprep.mubr.msk.bf16.mxu1 %vm3721_vm0, %v3717_v20  ;;  %v971_v42 = vunpack.c.l.s4 %v3722_v41  ;;  %v3723_v43 = vmov 1934713408   ;;  %vm1408_vm1 = vcmask 261120   ;;  %vm1608_vm2 = vcmask 64512  }
 0x178   : > { %2919 = vmatpush3.bf16.msra.mxu1 %v3221_v21  ;;  %v1003_v44 = vunpack.c.l.s4 %v3723_v43  ;;  %vm1660_vm3 = vcmask 1043456   ;;  %vm1991_vm4 = vcmask 523264   ;;  %vm1993_vm5 = vcmask 785408  }
 0x179   : > { %2920 = vmatprep.subr.bf16.mxu1 %v3717_v20  ;;  %v972_v45 = vunpack.c.0.s8 %v971_v42 }
 0x17a   : > { %884 = vmatpush1.bf16.msra.mxu0 %v3207_v8  ;;  %v1004_v48 = vunpack.c.0.s8 %v1003_v44 }
 0x17b   : > { %885 = vmatprep.subr.bf16.mxu0 %v3208_v9  ;;  %v4306_v49 = vsub.s32 %v972_v45, %v4280_v25 }
 0x17c   : > { %2921 = vmatpush3.bf16.msra.mxu1 %v3222_v22  ;;  %v4309_v56 = vsub.s32 %v1004_v48, %v4280_v25 }
 0x17d   : > { %2922 = vmatprep.subr.bf16.mxu1 %v3717_v20 }
 0x17e   : > { %886 = vmatpush1.bf16.msra.mxu0 %v3210_v10 }
 0x17f   : > { %887 = vmatprep.subr.bf16.mxu0 %v3211_v11 }
 0x180   : > { %2923 = vmatpush3.bf16.msra.mxu1 %v3223_v24 }
 0x181   : > { %2924 = vmatprep.subr.bf16.mxu1 %v3717_v20 }
 0x182   : > { %888 = vmatpush1.bf16.msra.mxu0 %v3213_v12 }
 0x183   : > { %889 = vmatprep.subr.bf16.mxu0 %v3214_v13 }
 0x184   : > { %2925 = vmatpush3.bf16.msra.mxu1 %v3224_v26 }
 0x185   : > { %2926 = vmatprep.subr.bf16.mxu1 %v3717_v20 }
 0x186   : > { %890 = vmatpush1.bf16.msra.mxu0 %v3216_v14 }
 0x187   : > { %891 = vmatprep.subr.bf16.mxu0 %v3217_v15 }
 0x188   : > { %2927 = vmatpush3.bf16.msra.mxu1 %v3225_v31 }
 0x189   : > { %2928 = vmatprep.subr.bf16.mxu1 %v3717_v20 }
 0x18a   : > { %892 = vmatpush1.bf16.msra.mxu0 %v3219_v16 }
 0x18b   : > { %2960 = vmatprep.subr.bf16.mxu0 %v3717_v20 }
 0x18c   : > { %2929 = vmatpush3.bf16.msra.mxu1 %v3226_v37 }
 0x18d   : > { %910 = vmatmul.mubr.bf16.vlgmr.msra.gmra.mrb[0].mxu0 %v699_v18  ;;  %2930 = vmatprep.subr.bf16.mxu1 %v3717_v20 }
 0x18e   : > { %2962 = vmatprep.mubr.msk.bf16.mxu0 %vm3721_vm0, %v3717_v20 }
 0x190   : > { %2931 = vmatpush3.bf16.msra.mxu1 %v3227_v40 }
 0x191   : > { %2936 = vmatprep.subr.bf16.mxu1 %v3717_v20 }
 0x193   : > { %2933 = vmatmul.mubr.bf16.vlgmr.msra.gmra.mrb[0].mxu1 %v699_v18 }
 0x194   : > { %2938 = vmatprep.mubr.msk.bf16.mxu1 %vm3721_vm0, %v3717_v20 }
 0x260   : > { %v911_v32 = vpop.f32.mrb[0].mxu0 }
 0x261   : > { %v913_v33 = vpop.f32.mrb[1].mxu0  ;;  %v912_v39 = vadd.f32 %v911_v32, %v737_v34 }
 0x262   : > { %v914_v35 = vadd.f32 %v913_v33, %v741_v30  ;;  %v915_v36 = vpop.f32.mrb[2].mxu0 }
 0x263   : > { %v916_v38 = vpop.f32.mrb[3].mxu0 }
 0x264   : > { %1115 = vrot.lane.b32.xlu1 %v914_v35, %s3718_s24  ;;  %1109 = vrot.lane.b32.xlu0 %v914_v35, %s3719_s6 }
 0x268   : > { %1112 = vrot.lane.b32.xlu0 %v914_v35, %s3720_s22  ;;  %959 = vrot.lane.b32.xlu1 %v912_v39, %s3719_s6 }
 0x26c   : > { %962 = vrot.lane.b32.xlu0 %v912_v39, %s3720_s22  ;;  %965 = vrot.lane.b32.xlu1 %v912_v39, %s3718_s24 }
 0x2d6   : > { %v1116_v46 = vpop.permute.xlu1 %1115  ;;  %v1110_v47 = vpop.permute.xlu0 %1109 }
 0x2d7   : > { %v1134_v50 = vcombine.low %v1110_v47, %v1116_v46  ;;  %v1135_v51 = vcombine.high %v1110_v47, %v1116_v46 }
 0x2d9   : > { %v1142_v57 = vrot.slane %v1134_v50, %v4306_v49  ;;  %v1149_v58 = vrot.slane %v1135_v51, %v4306_v49 }
 0x2da   : > { %v1113_v52 = vpop.permute.xlu0 %1112  ;;  %v960_v53 = vpop.permute.xlu1 %959 }
 0x2db   : > { %v1118_v54 = vcombine.low %v914_v35, %v1113_v52  ;;  %v1119_v55 = vcombine.high %v914_v35, %v1113_v52 }
 0x2dd   : > { %v1126_v59 = vrot.slane %v1118_v54, %v4306_v49  ;;  %v1133_v60 = vrot.slane %v1119_v55, %v4306_v49 }
 0x2de   : > { %v963_v61 = vpop.permute.xlu0 %962  ;;  %v966_v62 = vpop.permute.xlu1 %965 }
 0x2df   : > { %v1150_v63 = vcombine.low %v1126_v59, %v1142_v57  ;;  %v1151_v0 = vcombine.high %v1126_v59, %v1142_v57  ;;  %v1166_v1 = vcombine.low %v1133_v60, %v1149_v58  ;;  %v1167_v2 = vcombine.high %v1133_v60, %v1149_v58 }
 0x2e0   : > { %v968_v3 = vcombine.low %v912_v39, %v963_v61  ;;  %v969_v4 = vcombine.high %v912_v39, %v963_v61  ;;  %v984_v5 = vcombine.low %v960_v53, %v966_v62  ;;  %v985_v6 = vcombine.high %v960_v53, %v966_v62 }
 0x2e1   : > { %v1158_v7 = vrot.slane %v1150_v63, %v4309_v56  ;;  %v1165_v8 = vrot.slane %v1151_v0, %v4309_v56  ;;  %v1174_v9 = vrot.slane %v1166_v1, %v4309_v56  ;;  %v1181_v10 = vrot.slane %v1167_v2, %v4309_v56 }
 0x2e2   : > { %v976_v11 = vrot.slane %v968_v3, %v4306_v49  ;;  %v983_v12 = vrot.slane %v969_v4, %v4306_v49  ;;  %v992_v13 = vrot.slane %v984_v5, %v4306_v49  ;;  %v999_v14 = vrot.slane %v985_v6, %v4306_v49 }
 0x2e3   : > { %v1186_v15 = vcombine.low %v1158_v7, %v1165_v8  ;;  %v2795_v16 = vcombine.high %v1158_v7, %v1165_v8  ;;  %v1202_v18 = vcombine.low %v1174_v9, %v1181_v10  ;;  %v2796_v19 = vcombine.high %v1174_v9, %v1181_v10 }
 0x2e4   : > { %v1000_v21 = vcombine.low %v976_v11, %v992_v13  ;;  %v1001_v22 = vcombine.high %v976_v11, %v992_v13  ;;  %v1016_v23 = vcombine.low %v983_v12, %v999_v14  ;;  %v1017_v24 = vcombine.high %v983_v12, %v999_v14 }
 0x2e5   : > { %v1193_v26 = vrot.slane %v1186_v15, %v4306_v49  ;;  %v1201_v27 = vrot.slane %v2795_v16, %v4306_v49  ;;  %v1209_v29 = vrot.slane %v1202_v18, %v4306_v49  ;;  %v1217_v30 = vrot.slane %v2796_v19, %v4306_v49  ;;  %v952_v18 = vpop.f32.mrb[0].mxu1 }
 0x2e6   : > { %v1008_v31 = vrot.slane %v1000_v21, %v4309_v56  ;;  %v1015_v32 = vrot.slane %v1001_v22, %v4309_v56  ;;  %v1024_v33 = vrot.slane %v1016_v23, %v4309_v56  ;;  %v1031_v34 = vrot.slane %v1017_v24, %v4309_v56  ;;  %v2934_v19 = vpop.f32.mrb[1].mxu1  ;;  %v2803_v24 = vld [vmem:[%s689_s14] ss:$0 sm:$0xff]  ;;  %s4690_s14 = sld [smem:[#allocation48_spill]] }
 0x2e7   : > { %v1218_v35 = vcombine.low %v1193_v26, %v1201_v27  ;;  %v1234_v36 = vcombine.low %v1209_v29, %v1217_v30  ;;  %v1219_v57 = vcombine.high %v1193_v26, %v1201_v27  ;;  %v1235_v58 = vcombine.high %v1209_v29, %v1217_v30  ;;  %v955_v21 = vpop.f32.mrb[2].mxu1 }
 0x2e8   : > { %v1036_v37 = vcombine.low %v1008_v31, %v1015_v32  ;;  %v2793_v38 = vcombine.high %v1008_v31, %v1015_v32  ;;  %v1052_v39 = vcombine.low %v1024_v33, %v1031_v34  ;;  %v2794_v40 = vcombine.high %v1024_v33, %v1031_v34  ;;  %v2935_v22 = vpop.f32.mrb[3].mxu1 }
 0x2e9   : > { %v1226_v41 = vrot.slane %v1218_v35, %v4309_v56  ;;  %v1242_v42 = vrot.slane %v1234_v36, %v4309_v56  ;;  %v1233_v61 = vrot.slane %v1219_v57, %v4309_v56  ;;  %v1249_v62 = vrot.slane %v1235_v58, %v4309_v56 }
 0x2ea   : > { %v1043_v43 = vrot.slane %v1036_v37, %v4306_v49  ;;  %v1051_v44 = vrot.slane %v2793_v38, %v4306_v49  ;;  %v1059_v45 = vrot.slane %v1052_v39, %v4306_v49  ;;  %v1067_v46 = vrot.slane %v2794_v40, %v4306_v49 }
 0x2eb   : > { %v1250_v47 = vcombine.low %v1226_v41, %v1242_v42  ;;  %v1251_v55 = vcombine.high %v1226_v41, %v1242_v42  ;;  %v1252_v1 = vcombine.low %v1233_v61, %v1249_v62  ;;  %v1253_v10 = vcombine.high %v1233_v61, %v1249_v62 }
 0x2ec   : > { %v1068_v48 = vcombine.low %v1043_v43, %v1051_v44  ;;  %v1084_v50 = vcombine.low %v1059_v45, %v1067_v46  ;;  %v1069_v2 = vcombine.high %v1043_v43, %v1051_v44  ;;  %v1085_v3 = vcombine.high %v1059_v45, %v1067_v46 }
 0x2ed   : > { %v1254_v51 = vpack.c.bf16 %v1250_v47, %v1250_v47  ;;  %v1255_v60 = vpack.c.bf16 %v1251_v55, %v1251_v55  ;;  %v1256_v5 = vpack.c.bf16 %v1252_v1, %v1252_v1  ;;  %v1257_v12 = vpack.c.bf16 %v1253_v10, %v1253_v10 }
 0x2ee   : > { %v1076_v52 = vrot.slane %v1068_v48, %v4309_v56  ;;  %v1092_v53 = vrot.slane %v1084_v50, %v4309_v56  ;;  %v1083_v7 = vrot.slane %v1069_v2, %v4309_v56  ;;  %v1099_v8 = vrot.slane %v1085_v3, %v4309_v56 }
 0x2ef   : > { %v1413_v54 = vsel %vm1408_vm1, %v1254_v51, 0  ;;  %v1459_v0 = vsel %vm1408_vm1, %v1255_v60, 0  ;;  %v1505_v9 = vsel %vm1408_vm1, %v1256_v5, 0  ;;  %v1551_v14 = vsel %vm1408_vm1, %v1257_v12, 0 }
 0x2f0   : > { %2937 = vmatpush3.bf16.xpose.msra.mxu1 %v1413_v54  ;;  %v1100_v59 = vcombine.low %v1076_v52, %v1092_v53  ;;  %v1101_v4 = vcombine.high %v1076_v52, %v1092_v53  ;;  %v1102_v11 = vcombine.low %v1083_v7, %v1099_v8  ;;  %v1103_v15 = vcombine.high %v1083_v7, %v1099_v8 }
 0x2f1   : > { %2942 = vmatprep.subr.bf16.mxu1 %v3717_v20  ;;  %v744_v46 = vsub.s32 2, %v4280_v25 }
 0x2f2   : > { %v1104_v63 = vpack.c.bf16 %v1100_v59, %v1100_v59  ;;  %v1105_v6 = vpack.c.bf16 %v1101_v4, %v1101_v4  ;;  %v1106_v13 = vpack.c.bf16 %v1102_v11, %v1102_v11  ;;  %v1107_v16 = vpack.c.bf16 %v1103_v15, %v1103_v15 }
 0x2f3   : > { %v745_v50 = vrot.slane %v4284_v28, %v744_v46 }
 0x2f5   : > { %v953_v57 = vadd.f32 %v952_v18, %v745_v50 }
 0x2f7   : > { %2939 = vmatmul.mubr.msk.bf16.vlgmr.msra.gmra.mrb[4].mxu1 %vm1408_vm1, %v1104_v63 }
 0x2f8   : > { %2943 = vmatpush3.bf16.xpose.msra.mxu1 %v1459_v0  ;;  %2944 = vmatprep.mubr.msk.bf16.mxu1 %vm3721_vm0, %v3717_v20 }
 0x2f9   : > { %2948 = vmatprep.subr.bf16.mxu1 %v3717_v20 }
 0x2ff   : > { %2945 = vmatmul.mubr.msk.bf16.vlgmr.msra.gmra.mrb[8].mxu1 %vm1408_vm1, %v1105_v6 }
 0x300   : > { %2949 = vmatpush3.bf16.xpose.msra.mxu1 %v1505_v9  ;;  %2950 = vmatprep.mubr.msk.bf16.mxu1 %vm3721_vm0, %v3717_v20 }
 0x301   : > { %2954 = vmatprep.subr.bf16.mxu1 %v3717_v20 }
 0x307   : > { %2951 = vmatmul.mubr.msk.bf16.vlgmr.msra.gmra.mrb[12].mxu1 %vm1408_vm1, %v1106_v13 }
 0x308   : > { %2955 = vmatpush3.bf16.xpose.msra.mxu1 %v1551_v14  ;;  %2956 = vmatprep.mubr.msk.bf16.mxu1 %vm3721_vm0, %v3717_v20 }
 0x309   : > { %2966 = vmatprep.subr.bf16.mxu1 %v3717_v20 }
 0x30f   : > { %2957 = vmatmul.mubr.msk.bf16.vlgmr.msra.gmra.mrb[16].mxu1 %vm1408_vm1, %v1107_v16 }
 0x310   : > { %2968 = vmatprep.mubr.msk.bf16.mxu1 %vm3721_vm0, %v3717_v20 }
 0x3ca   : > { %v1449_v23 = vpop.f32.mrb[4].mxu1 }
 0x3cb   : > { %v1593_v26 = vmul.f32 0.17677669, %v1449_v23  ;;  %v2940_v27 = vpop.f32.mrb[5].mxu1 }
 0x3cc   : > { %v1452_v29 = vpop.f32.mrb[6].mxu1 }
 0x3cd   : > { %v2941_v30 = vpop.f32.mrb[7].mxu1  ;;  %v1604_v31 = vadd.f32 %v2803_v24, %v1593_v26 }
 0x3cf   : > { %v1609_v32 = vsel %vm1608_vm2, %v1604_v31, -inf }
 0x3d0   : > { %1610 = vmax.xlane.f32.xlu0 %v1609_v32 }
 0x3d2   : > { %v1495_v33 = vpop.f32.mrb[8].mxu1 }
 0x3d3   : > { %v1594_v34 = vmul.f32 0.17677669, %v1495_v33  ;;  %v2946_v35 = vpop.f32.mrb[9].mxu1 }
 0x3d4   : > { %v1498_v36 = vpop.f32.mrb[10].mxu1 }
 0x3d5   : > { %v2947_v37 = vpop.f32.mrb[11].mxu1  ;;  %v1605_v38 = vadd.f32 %v2803_v24, %v1594_v34 }
 0x3d7   : > { %v1612_v39 = vsel %vm1608_vm2, %v1605_v38, -inf }
 0x3d8   : > { %1613 = vmax.xlane.f32.xlu1 %v1612_v39 }
 0x3da   : > { %v1541_v40 = vpop.f32.mrb[12].mxu1 }
 0x3db   : > { %v1595_v41 = vmul.f32 0.17677669, %v1541_v40  ;;  %v2952_v42 = vpop.f32.mrb[13].mxu1 }
 0x3dc   : > { %v1544_v43 = vpop.f32.mrb[14].mxu1 }
 0x3dd   : > { %v2953_v44 = vpop.f32.mrb[15].mxu1  ;;  %v1606_v45 = vadd.f32 %v2803_v24, %v1595_v41 }
 0x3df   : > { %v1615_v47 = vsel %vm1608_vm2, %v1606_v45, -inf }
 0x3e0   : > { %1616 = vmax.xlane.f32.xlu0 %v1615_v47 }
 0x3e2   : > { %v1587_v48 = vpop.f32.mrb[16].mxu1 }
 0x3e3   : > { %v1596_v51 = vmul.f32 0.17677669, %v1587_v48  ;;  %v2958_v52 = vpop.f32.mrb[17].mxu1 }
 0x3e4   : > { %v1590_v53 = vpop.f32.mrb[18].mxu1 }
 0x3e5   : > { %v2959_v54 = vpop.f32.mrb[19].mxu1  ;;  %v1607_v55 = vadd.f32 %v2803_v24, %v1596_v51 }
 0x3e7   : > { %v1618_v58 = vsel %vm1608_vm2, %v1607_v55, -inf }
 0x3e8   : > { %1619 = vmax.xlane.f32.xlu0 %v1618_v58 }
 0x3e9   : > { %1259 = vrot.lane.b32.xlu1 %v953_v57, %s3719_s6 }
 0x45d   : > { %v1611_v59 = vpop.xlane.xlu0 %1610 }
 0x45e   : > { %v1621_v60 = vsub.f32 %v1604_v31, %v1611_v59 }
 0x460   : > { %v1625_v25 = vmul.f32 1.442695, %v1621_v60 }
 0x462   : > { %3236 = vpow2.f32 %v1625_v25 }
 0x465   : > { %v1614_v61 = vpop.xlane.xlu1 %1613 }
 0x466   : > { %v1622_v62 = vsub.f32 %v1605_v38, %v1614_v61 }
 0x468   : > { %v1627_v63 = vmul.f32 1.442695, %v1622_v62 }
 0x469   : > { %v1260_v13 = vpop.permute.xlu1 %1259 }
 0x46a   : > { %3238 = vpow2.f32 %v1627_v63 }
 0x46c   : > { %v4375_v28 = vpop.eup %3236 }
 0x46d   : > { %v1633_v0 = vsel %vm1608_vm2, %v4375_v28, 0.0  ;;  %v1617_v3 = vpop.xlane.xlu0 %1616 }
 0x46e   : > { %1634 = vadd.xlane.f32.xlu1 %v1633_v0  ;;  %v1623_v4 = vsub.f32 %v1606_v45, %v1617_v3 }
 0x470   : > { %v1629_v5 = vmul.f32 1.442695, %v1623_v4 }
 0x472   : > { %3240 = vpow2.f32 %v1629_v5 }
 0x474   : > { %v4379_v1 = vpop.eup %3238 }
 0x475   : > { %v1636_v2 = vsel %vm1608_vm2, %v4379_v1, 0.0  ;;  %v1620_v6 = vpop.xlane.xlu0 %1619 }
 0x476   : > { %1637 = vadd.xlane.f32.xlu0 %v1636_v2  ;;  %v1624_v7 = vsub.f32 %v1607_v55, %v1620_v6 }
 0x478   : > { %v1631_v8 = vmul.f32 1.442695, %v1624_v7 }
 0x47a   : > { %3242 = vpow2.f32 %v1631_v8 }
 0x47c   : > { %v4385_v9 = vpop.eup %3240 }
 0x47d   : > { %v1639_v10 = vsel %vm1608_vm2, %v4385_v9, 0.0 }
 0x47f   : > { %1265 = vrot.lane.b32.xlu1 %v953_v57, %s3718_s24 }
 0x484   : > { %v4389_v11 = vpop.eup %3242 }
 0x485   : > { %v1642_v12 = vsel %vm1608_vm2, %v4389_v11, 0.0 }
 0x48c   : > { %1262 = vrot.lane.b32.xlu0 %v953_v57, %s3720_s22 }
 0x4a3   : > { %1640 = vadd.xlane.f32.xlu1 %v1639_v10 }
 0x4ab   : > { %1643 = vadd.xlane.f32.xlu0 %v1642_v12 }
 0x4fb   : > { %v1635_v14 = vpop.xlane.xlu1 %1634 }
 0x4fc   : > { %3244 = vrcp.f32 %v1635_v14 }
 0x4ff   : > { %v1266_v15 = vpop.permute.xlu1 %1265 }
 0x500   : > { %v1284_v18 = vcombine.low %v1260_v13, %v1266_v15  ;;  %v1285_v19 = vcombine.high %v1260_v13, %v1266_v15 }
 0x502   : > { %v1292_v24 = vrot.slane %v1284_v18, %v4306_v49  ;;  %v1299_v26 = vrot.slane %v1285_v19, %v4306_v49  ;;  %v3228_v19 = vld [vmem:[#allocation10] sm:$0xff]  }
 0x503   : > { %v1638_v16 = vpop.xlane.xlu0 %1637 }
 0x504   : > { %3246 = vrcp.f32 %v1638_v16 }
 0x506   : > { %v3245_v51 = vpop.eup %3244 }
 0x507   : > { %v1263_v21 = vpop.permute.xlu0 %1262  ;;  %v1649_v61 = vmul.f32 %v3245_v51, %v4375_v28 }
 0x508   : > { %v1268_v22 = vcombine.low %v953_v57, %v1263_v21  ;;  %v1269_v23 = vcombine.high %v953_v57, %v1263_v21  ;;  %v3229_v21 = vld [vmem:[#allocation10 + $0x8] sm:$0xff]  }
 0x509   : > { %v1653_v6 = vpack.c.bf16 %v1649_v61, %v1649_v61 }
 0x50a   : > { %v1276_v27 = vrot.slane %v1268_v22, %v4306_v49  ;;  %v1283_v29 = vrot.slane %v1269_v23, %v4306_v49  ;;  %v3230_v22 = vld [vmem:[#allocation10 + $0x10] sm:$0xff]   ;;  %v3232_v23 = vld [vmem:[#allocation10 + $0x20] sm:$0xff]  }
 0x50c   : > { %v1300_v30 = vcombine.low %v1276_v27, %v1292_v24  ;;  %v1301_v31 = vcombine.high %v1276_v27, %v1292_v24  ;;  %v1316_v32 = vcombine.low %v1283_v29, %v1299_v26  ;;  %v1317_v33 = vcombine.high %v1283_v29, %v1299_v26 }
 0x50e   : > { %v1308_v34 = vrot.slane %v1300_v30, %v4309_v56  ;;  %v1315_v35 = vrot.slane %v1301_v31, %v4309_v56  ;;  %v1324_v36 = vrot.slane %v1316_v32, %v4309_v56  ;;  %v1331_v37 = vrot.slane %v1317_v33, %v4309_v56  ;;  %v3247_v57 = vpop.eup %3246 }
 0x50f   : > { %v1650_v62 = vmul.f32 %v3247_v57, %v4379_v1 }
 0x510   : > { %v1336_v38 = vcombine.low %v1308_v34, %v1315_v35  ;;  %v2797_v39 = vcombine.high %v1308_v34, %v1315_v35  ;;  %v1352_v40 = vcombine.low %v1324_v36, %v1331_v37  ;;  %v2798_v41 = vcombine.high %v1324_v36, %v1331_v37 }
 0x511   : > { %v1654_v7 = vpack.c.bf16 %v1650_v62, %v1650_v62 }
 0x512   : > { %v1343_v42 = vrot.slane %v1336_v38, %v4306_v49  ;;  %v1351_v43 = vrot.slane %v2797_v39, %v4306_v49  ;;  %v1359_v44 = vrot.slane %v1352_v40, %v4306_v49  ;;  %v1367_v45 = vrot.slane %v2798_v41, %v4306_v49 }
 0x514   : > { %v1368_v46 = vcombine.low %v1343_v42, %v1351_v43  ;;  %v1384_v47 = vcombine.low %v1359_v44, %v1367_v45  ;;  %v1369_v48 = vcombine.high %v1343_v42, %v1351_v43  ;;  %v1385_v50 = vcombine.high %v1359_v44, %v1367_v45 }
 0x516   : > { %v1376_v52 = vrot.slane %v1368_v46, %v4309_v56  ;;  %v1392_v53 = vrot.slane %v1384_v47, %v4309_v56  ;;  %v1383_v54 = vrot.slane %v1369_v48, %v4309_v56  ;;  %v1399_v55 = vrot.slane %v1385_v50, %v4309_v56 }
 0x518   : > { %v1400_v58 = vcombine.low %v1376_v52, %v1392_v53  ;;  %v1401_v59 = vcombine.high %v1376_v52, %v1392_v53  ;;  %v1402_v60 = vcombine.low %v1383_v54, %v1399_v55  ;;  %v1403_v25 = vcombine.high %v1383_v54, %v1399_v55  ;;  %v3234_v55 = vld [vmem:[#allocation10 + $0x30] sm:$0xff]  }
 0x51a   : > { %v1404_v63 = vpack.c.bf16 %v1400_v58, %v1400_v58  ;;  %v1405_v0 = vpack.c.bf16 %v1401_v59, %v1401_v59  ;;  %v1406_v4 = vpack.c.bf16 %v1402_v60, %v1402_v60  ;;  %v1407_v5 = vpack.c.bf16 %v1403_v25, %v1403_v25 }
 0x51c   : > { %v1662_v2 = vsel %vm1660_vm3, %v1404_v63, 0  ;;  %v1708_v3 = vsel %vm1660_vm3, %v1405_v0, 0  ;;  %v1754_v28 = vsel %vm1660_vm3, %v1406_v4, 0  ;;  %v1800_v1 = vsel %vm1660_vm3, %v1407_v5, 0  ;;  %v3235_v0 = vld [vmem:[#allocation10 + $0x38] sm:$0xff]  }
 0x51d   : > { %2961 = vmatpush3.bf16.msra.mxu0 %v1662_v2  ;;  %2967 = vmatpush3.bf16.msra.mxu1 %v1708_v3 }
 0x51e   : > { %2972 = vmatprep.subr.bf16.mxu0 %v3717_v20  ;;  %2978 = vmatprep.subr.bf16.mxu1 %v3717_v20 }
 0x520   : > { %2963 = vmatmul.mubr.msk.bf16.vlgmr.msra.gmra.mrb[4].mxu0 %vm1608_vm2, %v1653_v6  ;;  %2969 = vmatmul.mubr.msk.bf16.vlgmr.msra.gmra.mrb[20].mxu1 %vm1608_vm2, %v1654_v7 }
 0x521   : > { %2973 = vmatpush3.bf16.msra.mxu0 %v1754_v28  ;;  %2979 = vmatpush3.bf16.msra.mxu1 %v1800_v1 }
 0x522   : > { %2974 = vmatprep.mubr.msk.bf16.mxu0 %vm3721_vm0, %v3717_v20  ;;  %2980 = vmatprep.mubr.msk.bf16.mxu1 %vm3721_vm0, %v3717_v20 }
 0x523   : > { %2984 = vmatprep.subr.bf16.mxu0 %v3717_v20 }
 0x530   : > { %v1641_v8 = vpop.xlane.xlu1 %1640 }
 0x531   : > { %3248 = vrcp.f32 %v1641_v8 }
 0x538   : > { %v1644_v10 = vpop.xlane.xlu0 %1643 }
 0x539   : > { %3250 = vrcp.f32 %v1644_v10 }
 0x53b   : > { %v3249_v12 = vpop.eup %3248 }
 0x53c   : > { %v1651_v13 = vmul.f32 %v3249_v12, %v4385_v9  ;;  %v3231_v9 = vld [vmem:[#allocation10 + $0x18] sm:$0xff]  }
 0x53e   : > { %v1655_v14 = vpack.c.bf16 %v1651_v13, %v1651_v13 }
 0x540   : > { %2975 = vmatmul.mubr.msk.bf16.vlgmr.msra.gmra.mrb[8].mxu0 %vm1608_vm2, %v1655_v14 }
 0x541   : > { %3000 = vmatprep.mubr.msk.bf16.mxu0 %vm3721_vm0, %v3717_v20  ;;  %2985 = vmatpush3.bf16.msra.mxu0 %v3228_v19 }
 0x542   : > { %2986 = vmatprep.subr.bf16.mxu0 %v3717_v20 }
 0x543   : > { %v3251_v15 = vpop.eup %3250 }
 0x544   : > { %v1652_v16 = vmul.f32 %v3251_v15, %v4389_v11  ;;  %v3233_v11 = vld [vmem:[#allocation10 + $0x28] sm:$0xff]  }
 0x545   : > { %2987 = vmatpush3.bf16.msra.mxu0 %v3229_v21 }
 0x546   : > { %v1656_v18 = vpack.c.bf16 %v1652_v16, %v1652_v16  ;;  %2988 = vmatprep.subr.bf16.mxu0 %v3717_v20 }
 0x548   : > { %2981 = vmatmul.mubr.msk.bf16.vlgmr.msra.gmra.mrb[24].mxu1 %vm1608_vm2, %v1656_v18 }
 0x549   : > { %2989 = vmatpush3.bf16.msra.mxu0 %v3230_v22 }
 0x54a   : > { %2990 = vmatprep.subr.bf16.mxu0 %v3717_v20 }
 0x54d   : > { %2991 = vmatpush3.bf16.msra.mxu0 %v3231_v9 }
 0x54e   : > { %2992 = vmatprep.subr.bf16.mxu0 %v3717_v20 }
 0x551   : > { %2993 = vmatpush3.bf16.msra.mxu0 %v3232_v23  ;;  %v2810_v23 = vld [vmem:[#allocation12] ss:$0 sm:$0xff] }
 0x552   : > { %2994 = vmatprep.subr.bf16.mxu0 %v3717_v20 }
 0x555   : > { %2995 = vmatpush3.bf16.msra.mxu0 %v3233_v11 }
 0x556   : > { %2996 = vmatprep.subr.bf16.mxu0 %v3717_v20 }
 0x559   : > { %2997 = vmatpush3.bf16.msra.mxu0 %v3234_v55  ;;  %v2138_v55 = vld [vmem:[%s4689_s27] sm:$0xff] }
 0x55a   : > { %2998 = vmatprep.subr.bf16.mxu0 %v3717_v20 }
 0x55d   : > { %2999 = vmatpush3.bf16.msra.mxu0 %v3235_v0 }
 0x5f3   : > { %v1698_v24 = vpop.f32.mrb[4].mxu0  ;;  %v1744_v26 = vpop.f32.mrb[20].mxu1 }
 0x5f4   : > { %v2964_v27 = vpop.f32.mrb[5].mxu0  ;;  %v2970_v29 = vpop.f32.mrb[21].mxu1 }
 0x5f5   : > { %v1701_v30 = vpop.f32.mrb[6].mxu0  ;;  %v1747_v31 = vpop.f32.mrb[22].mxu1 }
 0x5f6   : > { %v2965_v32 = vpop.f32.mrb[7].mxu0  ;;  %v2971_v33 = vpop.f32.mrb[23].mxu1 }
 0x613   : > { %v1790_v34 = vpop.f32.mrb[8].mxu0 }
 0x614   : > { %v1842_v35 = vcombine.low %v1698_v24, %v1790_v34  ;;  %v1843_v36 = vcombine.high %v1698_v24, %v1790_v34  ;;  %v2976_v37 = vpop.f32.mrb[9].mxu0 }
 0x615   : > { %v1793_v38 = vpop.f32.mrb[10].mxu0 }
 0x616   : > { %v2977_v39 = vpop.f32.mrb[11].mxu0  ;;  %v1850_v45 = vrot.slane %v1842_v35, %v4306_v49  ;;  %v1857_v46 = vrot.slane %v1843_v36, %v4306_v49 }
 0x61b   : > { %v1836_v40 = vpop.f32.mrb[24].mxu1 }
 0x61c   : > { %v1858_v41 = vcombine.low %v1744_v26, %v1836_v40  ;;  %v1859_v42 = vcombine.high %v1744_v26, %v1836_v40  ;;  %v2982_v43 = vpop.f32.mrb[25].mxu1 }
 0x61d   : > { %v1839_v44 = vpop.f32.mrb[26].mxu1 }
 0x61e   : > { %v1866_v47 = vrot.slane %v1858_v41, %v4306_v49  ;;  %v1873_v48 = vrot.slane %v1859_v42, %v4306_v49  ;;  %v2983_v50 = vpop.f32.mrb[27].mxu1 }
 0x620   : > { %v1874_v51 = vcombine.low %v1850_v45, %v1866_v47  ;;  %v1875_v52 = vcombine.high %v1850_v45, %v1866_v47  ;;  %v1890_v53 = vcombine.low %v1857_v46, %v1873_v48  ;;  %v1891_v54 = vcombine.high %v1857_v46, %v1873_v48 }
 0x622   : > { %v1882_v57 = vrot.slane %v1874_v51, %v4309_v56  ;;  %v1889_v58 = vrot.slane %v1875_v52, %v4309_v56  ;;  %v1898_v59 = vrot.slane %v1890_v53, %v4309_v56  ;;  %v1905_v60 = vrot.slane %v1891_v54, %v4309_v56 }
 0x624   : > { %v1910_v25 = vcombine.low %v1882_v57, %v1889_v58  ;;  %v2808_v61 = vcombine.high %v1882_v57, %v1889_v58  ;;  %v1926_v62 = vcombine.low %v1898_v59, %v1905_v60  ;;  %v2809_v63 = vcombine.high %v1898_v59, %v1905_v60  ;;  %v2140_v58 = vld [vmem:[%s4690_s14] sm:$0xff] }
 0x626   : > { %v1917_v2 = vrot.slane %v1910_v25, %v4306_v49  ;;  %v1925_v3 = vrot.slane %v2808_v61, %v4306_v49  ;;  %v1933_v4 = vrot.slane %v1926_v62, %v4306_v49  ;;  %v1941_v5 = vrot.slane %v2809_v63, %v4306_v49 }
 0x628   : > { %v1943_v6 = vcombine.high %v1917_v2, %v1925_v3  ;;  %v1959_v7 = vcombine.high %v1933_v4, %v1941_v5  ;;  %v1942_v28 = vcombine.low %v1917_v2, %v1925_v3  ;;  %v1958_v1 = vcombine.low %v1933_v4, %v1941_v5 }
 0x62a   : > { %v1957_v20 = vrot.slane %v1943_v6, %v4309_v56  ;;  %v1973_v8 = vrot.slane %v1959_v7, %v4309_v56  ;;  %v1950_v10 = vrot.slane %v1942_v28, %v4309_v56  ;;  %v1966_v12 = vrot.slane %v1958_v1, %v4309_v56 }
 0x62c   : > { %v1976_v13 = vcombine.low %v1957_v20, %v1973_v8  ;;  %v1975_v14 = vcombine.high %v1950_v10, %v1966_v12  ;;  %v1977_v15 = vcombine.high %v1957_v20, %v1973_v8  ;;  %v1974_v16 = vcombine.low %v1950_v10, %v1966_v12 }
 0x62e   : > { %1983 = vrot.lane.b32.xlu1 %v1976_v13, %s3720_s22  ;;  %1979 = vrot.lane.b32.xlu0 %v1975_v14, %s3718_s24 }
 0x632   : > { %1987 = vrot.lane.b32.xlu1 %v1977_v15, %s3719_s6 }
 0x6a0   : > { %v1984_v49 = vpop.permute.xlu1 %1983  ;;  %v1980_v18 = vpop.permute.xlu0 %1979 }
 0x6a1   : > { %v1990_v19 = vsel %vm1408_vm1, %v1974_v16, %v1980_v18 }
 0x6a2   : > { %v1992_v22 = vsel %vm1991_vm4, %v1990_v19, %v1984_v49 }
 0x6a4   : > { %v1988_v21 = vpop.permute.xlu1 %1987 }
 0x6a5   : > { %v1994_v9 = vsel %vm1993_vm5, %v1992_v22, %v1988_v21 }
 0x6a6   : > { %v1995_v56 = vpack.c.bf16 %v1994_v9, %v1994_v9 }
 0x6a8   : > { %3001 = vmatmul.mubr.bf16.vlgmr.msra.gmra.mrb[12].mxu0 %v1995_v56 }
 0x77b   : > { %v2101_v11 = vpop.f32.mrb[12].mxu0 }
 0x77c   : > { %v2102_v24 = vadd.f32 %v2810_v23, %v2101_v11  ;;  %v3002_v26 = vpop.f32.mrb[13].mxu0 }
 0x77d   : > { %v2104_v27 = vpop.f32.mrb[14].mxu0 }
 0x77e   : > { %v2107_v29 = vadd.f32 %v2102_v24, %v4270_v17  ;;  %v3003_v30 = vpop.f32.mrb[15].mxu0 }
 0x780   : > { %2108 = vadd.xlane.f32.xlu0 %v2107_v29  ;;  %v2118_v31 = vmul.f32 %v2107_v29, %v2107_v29 }
 0x782   : > { %2119 = vadd.xlane.f32.xlu1 %v2118_v31 }
 0x80d   : > { %v2109_v32 = vpop.xlane.xlu0 %2108 }
 0x80e   : > { %v2110_v33 = vrot.slane %v2109_v32, 4 }
 0x80f   : > { %v2120_v34 = vpop.xlane.xlu1 %2119 }
 0x810   : > { %v2111_v35 = vadd.f32 %v2110_v33, %v2109_v32  ;;  %v2121_v36 = vrot.slane %v2120_v34, 4 }
 0x812   : > { %v2112_v37 = vrot.slane %v2111_v35, 2  ;;  %v2122_v38 = vadd.f32 %v2121_v36, %v2120_v34 }
 0x814   : > { %v2123_v39 = vrot.slane %v2122_v38, 2  ;;  %v2113_v40 = vadd.f32 %v2112_v37, %v2111_v35 }
 0x816   : > { %v2124_v41 = vadd.f32 %v2123_v39, %v2122_v38  ;;  %v2114_v42 = vrot.slane %v2113_v40, 1 }
 0x818   : > { %v2115_v43 = vadd.f32 %v2114_v42, %v2113_v40  ;;  %v2125_v44 = vrot.slane %v2124_v41, 1 }
 0x81a   : > { %3004 = vpush %v2115_v43  ;;  %v2126_v45 = vadd.f32 %v2125_v44, %v2124_v41 }
 0x81c   : > { %3006 = vpush %v2126_v45 }
 0x84b   : > { %s3005_s11 = spop %3004 }
 0x84c   : > { %v2117_v17 = vstv %s3005_s11 }
 0x84d   : > { %v2130_v46 = vmul.f32 0.0009765625, %v2117_v17  ;;  %s3007_s30 = spop %3006 }
 0x84e   : > { %v2128_v47 = vstv %s3007_s30 }
 0x84f   : > { %v2132_v48 = vmul.f32 %v2130_v46, %v2130_v46  ;;  %v2131_v50 = vmul.f32 0.0009765625, %v2128_v47  ;;  %v2134_v53 = vsub.f32 %v2107_v29, %v2130_v46 }
 0x851   : > { %v2133_v51 = vsub.f32 %v2131_v50, %v2132_v48 }
 0x853   : > { %v2135_v52 = vadd.f32 1e-06, %v2133_v51 }
 0x855   : > { %3252 = vrsqrt.f32 %v2135_v52 }
 0x85f   : > { %v3253_v54 = vpop.eup %3252 }
 0x860   : > { %v2137_v57 = vmul.f32 %v3253_v54, %v2134_v53 }
 0x862   : > { %v2139_v59 = vmul.f32 %v2138_v55, %v2137_v57 }
 0x864   : > { %v2141_v60 = vadd.f32 %v2140_v58, %v2139_v59 }
 0x866   : > { %2142 = vst [vmem:[#allocation2] sm:$0xff] %v2141_v60 }
 0x867 PF: > { %v3254_v25 = vld [vmem:[%s4239_s1 + $0x4] ss:$8 sps:$4 sm:$0xff]   ;;  %v3256_v61 = vld [vmem:[%s4239_s1] ss:$8 sps:$4 sm:$0xff]   ;;  %v3724_v62 = vmov 0   ;;  %v3282_v10 = vld [vmem:[%s4248_s13 + $0x50] sm:$0xff]   ;;  %v2164_v31 = vlaneseq }
 0x868   : > { %2286 = vmatprep.mubr.bf16.mxu0 %v3724_v62  ;;  %2254 = vmatprep.subr.bf16.mxu0 %v3254_v25  ;;  %v3257_v63 = vld [vmem:[%s4239_s1 + $0x14] ss:$8 sps:$4 sm:$0xff]   ;;  %v3259_v0 = vld [vmem:[%s4239_s1 + $0x10] ss:$8 sps:$4 sm:$0xff]   ;;  %v3260_v2 = vld [vmem:[%s4239_s1 + $0x24] ss:$8 sps:$4 sm:$0xff]  }
 0x869   : > { %2255 = vmatpush1.bf16.msra.mxu0 %v3256_v61  ;;  %v3262_v3 = vld [vmem:[%s4239_s1 + $0x20] ss:$8 sps:$4 sm:$0xff]   ;;  %v3263_v4 = vld [vmem:[%s4239_s1 + $0x34] ss:$8 sps:$4 sm:$0xff]   ;;  %v3265_v5 = vld [vmem:[%s4239_s1 + $0x30] ss:$8 sps:$4 sm:$0xff]  }
 0x86a   : > { %2256 = vmatprep.subr.bf16.mxu0 %v3257_v63  ;;  %v3266_v6 = vld [vmem:[%s4239_s1 + $0x44] ss:$8 sps:$4 sm:$0xff]   ;;  %v3268_v1 = vld [vmem:[%s4239_s1 + $0x40] ss:$8 sps:$4 sm:$0xff]   ;;  %v3269_v12 = vld [vmem:[%s4239_s1 + $0x54] ss:$8 sps:$4 sm:$0xff]  }
 0x86b   : > { %v3278_v7 = vld [vmem:[%s4248_s13 + $0x40] sm:$0xff]   ;;  %v3280_v20 = vld [vmem:[%s4248_s13 + $0x48] sm:$0xff]   ;;  %v3283_v14 = vld [vmem:[%s4248_s13 + $0x10] sm:$0xff]   ;;  %v2165_v32 = vshrl.u32 %v2164_v31, 7 }
 0x86c   : > { %v3279_v28 = vld [vmem:[%s4248_s13] sm:$0xff]   ;;  %2894 = vmatprep.subr.bf16.mxu1 %v3278_v7  ;;  %v3281_v8 = vld [vmem:[%s4248_s13 + $0x8] sm:$0xff]   ;;  %v3284_v15 = vld [vmem:[%s4248_s13 + $0x58] sm:$0xff]  }
 0x86d   : > { %2257 = vmatpush1.bf16.msra.mxu0 %v3259_v0  ;;  %2895 = vmatpush3.bf16.msra.mxu1 %v3279_v28  ;;  %v3271_v13 = vld [vmem:[%s4239_s1 + $0x50] ss:$8 sps:$4 sm:$0xff]   ;;  %v3272_v16 = vld [vmem:[%s4239_s1 + $0x64] ss:$8 sps:$4 sm:$0xff]   ;;  %v3274_v49 = vld [vmem:[%s4239_s1 + $0x60] ss:$8 sps:$4 sm:$0xff]  }
 0x86e   : > { %2258 = vmatprep.subr.bf16.mxu0 %v3260_v2  ;;  %2896 = vmatprep.subr.bf16.mxu1 %v3280_v20  ;;  %v3275_v18 = vld [vmem:[%s4239_s1 + $0x74] ss:$8 sps:$4 sm:$0xff]   ;;  %v3286_v21 = vld [vmem:[%s4248_s13 + $0x60] sm:$0xff]   ;;  %v3277_v9 = vld [vmem:[%s4239_s1 + $0x70] ss:$8 sps:$4 sm:$0xff]   ;;  %v2166_v33 = vsub.s32 0, %v2165_v32 }
 0x86f   : > { %v3285_v19 = vld [vmem:[%s4248_s13 + $0x18] sm:$0xff]   ;;  %v3287_v22 = vld [vmem:[%s4248_s13 + $0x20] sm:$0xff]   ;;  %v3288_v23 = vld [vmem:[%s4248_s13 + $0x68] sm:$0xff]   ;;  %v2170_v35 = vsub.s32 1, %v2165_v32  ;;  %s4691_s1 = sld [smem:[#allocation29_spill]] }
 0x870   : > { %v2144_v56 = vld [vmem:[#allocation2] sm:$0xff]  ;;  %v3289_v24 = vld [vmem:[%s4248_s13 + $0x28] sm:$0xff]   ;;  %v2297_v48 = vld [vmem:[#allocation3] sm:$0xff] }
 0x871   : > { %2259 = vmatpush1.bf16.msra.mxu0 %v3262_v3  ;;  %2897 = vmatpush3.bf16.msra.mxu1 %v3281_v8  ;;  %v2145_v11 = vpack.c.bf16 %v2144_v56, %v2144_v56  ;;  %v3290_v26 = vld [vmem:[%s4248_s13 + $0x70] sm:$0xff]   ;;  %v3292_v29 = vld [vmem:[%s4248_s13 + $0x78] sm:$0xff]  }
 0x872   : > { %2260 = vmatprep.subr.bf16.mxu0 %v3263_v4  ;;  %2898 = vmatprep.subr.bf16.mxu1 %v3282_v10  ;;  %v3291_v27 = vld [vmem:[%s4248_s13 + $0x30] sm:$0xff]   ;;  %v3293_v30 = vld [vmem:[%s4248_s13 + $0x38] sm:$0xff]  }
 0x873   : > { %v2162_v34 = vld [vmem:[%s611_s8] sm:$0x3] }
 0x874   : > { %v2167_v36 = vrot.slane %v2162_v34, %v2166_v33  ;;  %v2171_v37 = vrot.slane %v2162_v34, %v2170_v35 }
 0x875   : > { %2261 = vmatpush1.bf16.msra.mxu0 %v3265_v5  ;;  %2899 = vmatpush3.bf16.msra.mxu1 %v3283_v14  ;;  %p2851_p13 = scmp.ne.s32.totalorder %s4691_s1, 1 }
 0x876   : > { %2262 = vmatprep.subr.bf16.mxu0 %v3266_v6  ;;  %2900 = vmatprep.subr.bf16.mxu1 %v3284_v15  ;;  %v2474_v55 = vld [vmem:[#allocation2] sm:$0xff] (!%p2851_p13)  ;;  %v2852_v58 = vld [vmem:[#allocation18] ss:$0 sm:$0xff] (!%p2851_p13)  ;;  %s4692_s24 = sld [smem:[#allocation49_spill]] (!%p2851_p13)  ;;  %s4693_s10 = sld [smem:[#allocation50_spill]] (!%p2851_p13) }
 0x879   : > { %2263 = vmatpush1.bf16.msra.mxu0 %v3268_v1  ;;  %2901 = vmatpush3.bf16.msra.mxu1 %v3285_v19 }
 0x87a   : > { %2264 = vmatprep.subr.bf16.mxu0 %v3269_v12  ;;  %2902 = vmatprep.subr.bf16.mxu1 %v3286_v21 }
 0x87c   : > { %v2515_v21 = vld [vmem:[%s4692_s24] sm:$0xff] (!%p2851_p13) }
 0x87d   : > { %2265 = vmatpush1.bf16.msra.mxu0 %v3271_v13  ;;  %2903 = vmatpush3.bf16.msra.mxu1 %v3287_v22 }
 0x87e   : > { %2266 = vmatprep.subr.bf16.mxu0 %v3272_v16  ;;  %2904 = vmatprep.subr.bf16.mxu1 %v3288_v23 }
 0x881   : > { %2267 = vmatpush1.bf16.msra.mxu0 %v3274_v49  ;;  %2905 = vmatpush3.bf16.msra.mxu1 %v3289_v24 }
 0x882   : > { %2268 = vmatprep.subr.bf16.mxu0 %v3275_v18  ;;  %2906 = vmatprep.subr.bf16.mxu1 %v3290_v26 }
 0x885   : > { %2269 = vmatpush1.bf16.msra.mxu0 %v3277_v9  ;;  %2907 = vmatpush3.bf16.msra.mxu1 %v3291_v27  ;;  %v2517_v9 = vld [vmem:[%s4693_s10] sm:$0xff] (!%p2851_p13) }
 0x886   : > { %2908 = vmatprep.subr.bf16.mxu1 %v3292_v29 }
 0x888   : > { %2287 = vmatmul.mubr.bf16.vlgmr.msra.gmra.mrb[0].mxu0 %v2145_v11 }
 0x889   : > { %2909 = vmatpush3.bf16.msra.mxu1 %v3293_v30 }
 0x95b   : > { %v2288_v38 = vpop.f32.mrb[0].mxu0 }
 0x95c   : > { %v2289_v39 = vadd.f32 %v2288_v38, %v2167_v36  ;;  %v2290_v40 = vpop.f32.mrb[1].mxu0 }
 0x95d   : > { %v2291_v41 = vadd.f32 %v2290_v40, %v2171_v37  ;;  %v2292_v42 = vpop.f32.mrb[2].mxu0 }
 0x95e   : > { %v2295_v43 = vmax.f32 %v2289_v39, 0.0  ;;  %v2293_v44 = vpop.f32.mrb[3].mxu0 }
 0x95f   : > { %v2296_v45 = vmax.f32 %v2291_v41, 0.0 }
 0x960   : > { %v2298_v46 = vpack.c.bf16 %v2295_v43, %v2295_v43 }
 0x961   : > { %v2299_v17 = vpack.c.bf16 %v2296_v45, %v2296_v45 }
 0x963   : > { %2460 = vmatprep.mubr.bf16.mxu1 %v2299_v17 }
 0x964   : > { %2461 = vmatmul.mubr.bf16.vlgmr.msra.gmra.mrb[0].mxu1 %v2298_v46 }
 0xa37   : > { %v2910_v47 = vpop.f32.mrb[0].mxu1  ;;  %2473 = sbr.rel (%p2851_p13) target bundleno = 2866 (0xb32), region = 120 }
 0xa38   : > { %v2911_v50 = vpop.f32.mrb[1].mxu1 }
 0xa39   : > { %v2912_v51 = vadd.f32 %v2911_v50, %v2910_v47  ;;  %v2913_v52 = vpop.f32.mrb[2].mxu1 }
 0xa3a   : > { %v2914_v53 = vpop.f32.mrb[3].mxu1 }
 0xa3b   : > { %v2468_v54 = vadd.f32 %v2912_v51, %v2297_v48 }
 0xa3d   : > { %2469 = vst [vmem:[#allocation3] sm:$0xff] %v2468_v54 }
 0xa44   : > { %v2475_v57 = vld [vmem:[#allocation3] sm:$0xff] }
 0xa45   : > { %v2483_v59 = vadd.f32 %v2852_v58, %v2475_v57 }
 0xa47   : > { %v2484_v60 = vadd.f32 %v2483_v59, %v2474_v55 }
 0xa49   : > { %2485 = vadd.xlane.f32.xlu0 %v2484_v60  ;;  %v2495_v25 = vmul.f32 %v2484_v60, %v2484_v60 }
 0xa4d   : > { %2496 = vadd.xlane.f32.xlu0 %v2495_v25 }
 0xad6   : > { %v2486_v61 = vpop.xlane.xlu0 %2485 }
 0xad7   : > { %v2487_v62 = vrot.slane %v2486_v61, 4 }
 0xad9   : > { %v2488_v63 = vadd.f32 %v2487_v62, %v2486_v61 }
 0xada   : > { %v2497_v0 = vpop.xlane.xlu0 %2496 }
 0xadb   : > { %v2489_v2 = vrot.slane %v2488_v63, 2  ;;  %v2498_v3 = vrot.slane %v2497_v0, 4 }
 0xadd   : > { %v2499_v4 = vadd.f32 %v2498_v3, %v2497_v0  ;;  %v2490_v5 = vadd.f32 %v2489_v2, %v2488_v63 }
 0xadf   : > { %v2500_v6 = vrot.slane %v2499_v4, 2  ;;  %v2491_v7 = vrot.slane %v2490_v5, 1 }
 0xae1   : > { %v2501_v28 = vadd.f32 %v2500_v6, %v2499_v4  ;;  %v2492_v1 = vadd.f32 %v2491_v7, %v2490_v5 }
 0xae3   : > { %3008 = vpush %v2492_v1  ;;  %v2502_v20 = vrot.slane %v2501_v28, 1 }
 0xae5   : > { %v2503_v8 = vadd.f32 %v2502_v20, %v2501_v28 }
 0xae7   : > { %3010 = vpush %v2503_v8 }
 0xb14   : > { %s3009_s20 = spop %3008 }
 0xb15   : > { %v2494_v10 = vstv %s3009_s20 }
 0xb16   : > { %v2507_v12 = vmul.f32 0.0009765625, %v2494_v10 }
 0xb18   : > { %s3011_s8 = spop %3010  ;;  %v2509_v14 = vmul.f32 %v2507_v12, %v2507_v12  ;;  %v2511_v18 = vsub.f32 %v2484_v60, %v2507_v12 }
 0xb19   : > { %v2505_v13 = vstv %s3011_s8 }
 0xb1a   : > { %v2508_v15 = vmul.f32 0.0009765625, %v2505_v13 }
 0xb1c   : > { %v2510_v16 = vsub.f32 %v2508_v15, %v2509_v14 }
 0xb1e   : > { %v2512_v49 = vadd.f32 1e-06, %v2510_v16 }
 0xb20   : > { %3294 = vrsqrt.f32 %v2512_v49 }
 0xb2a   : > { %v3295_v19 = vpop.eup %3294 }
 0xb2b   : > { %v2514_v22 = vmul.f32 %v3295_v19, %v2511_v18 }
 0xb2d   : > { %v2516_v56 = vmul.f32 %v2515_v21, %v2514_v22 }
 0xb2f   : > { %v2518_v23 = vadd.f32 %v2517_v9, %v2516_v56 }
 0xb31   : > { %2519 = vst [vmem:[%s4266_s5] sm:$0xff] %v2518_v23 }
 0xb32 PF: > { %s4694_s9 = sld [smem:[#allocation30_spill]]  ;;  %s2534_s27 = sshll.u32 %s4266_s5, 4  ;;  %s2535_s27 = int_to_ptr.vmem [resolvable:$true] %s2534_s27 }
 0xb33   : > { %s4695_s2 = sld [smem:[#allocation51_spill]]  ;;  %s2521_s0 = scalar_lea.sflag [#allocation6], %s4219_s19 }
 0xb34   : > { %s3556_s28 = scalar_lea.vmem %s2535_s27, 128  ;;  %p4696_p12 = scmp.ne.s32.totalorder %s4658_s7, 0 }
 0xb35   : > { %p3557_p8 = scmp.ne.s32.totalorder %s2535_s27, %s3556_s28  ;;  %s3725_s14 = smov [#allocation19]  }
 0xb36   : > { %s3560_s1 = sshll.u32 %s3725_s14, 4  ;;  %s3561_s1 = int_to_ptr.vmem [resolvable:$false] %s3560_s1 }
 0xb37   : > { %p3558_p0 = pnand %p3557_p8, %p4696_p12  ;;  %s3562_s20 = scalar_lea.vmem %s3561_s1, 256 }
 0xb38   : > { %s2854_s26 = sshll.u32 %s4694_s9, 7  ;;  %p3563_p5 = scmp.lt.s32.totalorder %s2535_s27, %s3561_s1 }
 0xb39   : > { %s4510_s18 = scalar_lea.hbm %s4695_s2, %s2854_s26  ;;  %p3559_p3 = pneg %p3558_p0 }
 0xb3a   : > { %p3564_p9 = scmp.lt.s32.totalorder %s3562_s20, %s3556_s28 }
 0xb3c   : > { %p3565_p11 = por %p3564_p9, %p3563_p5 }
 0xb3e   : > { %p3566_p2 = pnand %p3565_p11, %p3559_p3 }
 0xb40   : > { %3569 = shalt.err (!%p3566_p2)
}
 0xb41   : > { %s3570_s19 = scalar_lea.hbm %s4510_s18, 128  ;;  %s3574_s13 = scalar_lea.hbm %s4695_s2, 256 }
 0xb42   : > { %p3571_p1 = scmp.ne.s32.totalorder %s4510_s18, %s3570_s19  ;;  %p3575_p4 = scmp.lt.u32.totalorder %s4510_s18, %s4695_s2 }
 0xb43   : > { %p3576_p7 = scmp.lt.u32.totalorder %s3574_s13, %s3570_s19  ;;  %p3578_p8 = scmp.lt.u32.totalorder %s3570_s19, %s4510_s18 }
 0xb44   : > { %p3572_p10 = pnand %p3571_p1, %p4696_p12 }
 0xb45   : > { %p3577_p13 = por %p3576_p7, %p3575_p4 }
 0xb46   : > { %p3573_p6 = pneg %p3572_p10 }
 0xb47   : > { %p3579_p0 = por %p3578_p8, %p3577_p13 }
 0xb49   : > { %p3580_p3 = pnand %p3579_p0, %p3573_p6 }
 0xb4b   : > { %3583 = shalt.err (!%p3580_p3)
}
 0xb4c   : > { %3040 = dma.vmem_to_hbm [thread:$0]  (%p4696_p12), %s2535_s27, 128, %s4510_s18, %s2521_s0  }
 0xb4d PF: > { %p3086_p5 = scmp.ge.s32.totalorder %s3698_s23, 2  ;;  %s2546_s6 = sand.u32 1, %s3670_s16  }
 0xb4e   : > { %p4697_p9 = scmp.ne.s32.totalorder %s4660_s4, 0  ;;  %s2547_s22 = scalar_lea.sflag [#allocation6], %s2546_s6 }
 0xb50   : > { %p3072_p11 = pnand %p3086_p5, %p4697_p9 }
 0xb52   : > { %3653 = dma.done.wait (!%p3072_p11), %s2547_s22, 128  }
 0xb53   : > { %3655 = vsyncadd (!%p3072_p11), %s2547_s22, 4294967168  ;;  %s38_s23 = sadd.s32 1, %s3698_s23   ;;  %s4698_s29 = sld [smem:[#allocation27_spill]] }
 0xb54   : > { %p35_p2 = scmp.ge.s32.totalorder %s38_s23, 6   ;;  %s4699_s7 = sld [smem:[#allocation28_spill]] }
 0xb55   : > { %s4700_s18 = sld [smem:[#allocation36_spill]]  ;;  %s4701_s20 = sld [smem:[#allocation31_spill]] }
 0xb56   : > { %s4702_s10 = sld [smem:[#allocation34_spill]]  ;;  %s4703_s22 = sld [smem:[#allocation35_spill]] }
 0xb57   : > { %s4704_s30 = smov %s3666_s15  ;;  %s4705_s15 = smov %s4092_s12 }
 0xb58   : > { %s4706_s16 = smov %s3674_s17  ;;  %s4708_s19 = smov %s3690_s21 }
 0xb59   :  { %37 = sbr.rel (!%p35_p2) target bundleno = 31 (0x1f), region = 189 }
 0xb5a   : > { %s4707_s17 = smov %s4699_s7 }
 0xb5c   : > { %s4709_s21 = smov %s4702_s10 }
 0xb60   :  { %2552 = vsyncpa [#allocation5], 1 }
 0xb61   :  { %2554 = vsyncpa [#allocation5 + $0x1], 1 }
 0xb62   :  { %2555 = vsyncpa [#allocation8], 1 }
 0xb63   :  { %2556 = vsyncpa [#allocation11], 1 }
 0xb64   :  { %2557 = vsyncpa [#allocation14], 1 }
 0xb65   :  { %2559 = vsyncpa [#allocation14 + $0x1], 1 }
 0xb66   :  { %2560 = vsyncpa [#allocation17], 1 }
 0xb67   :  { %2562 = vsyncpa [#allocation17 + $0x1], 1 }
 0xb68   :  { %2563 = vsyncpa [#allocation6], 1 }
 0xb69   :  { %2565 = vsyncpa [#allocation6 + $0x1], 1 }

</bundles_post_ra>
